<compile_context>
chip_gen: v5e
topology: v5e:2x2
jax: 0.10.0
libtpu: 0.0.40
codegen_flags: <defaults>
</compile_context>

<pallas_src>
import functools

import jax
import jax.numpy as jnp
from jax import lax
from jax.experimental import pallas as pl
from jax.experimental.pallas import tpu as pltpu

EPS = 1e-5


def _round8(c):
    return ((c + 7) // 8) * 8


def _double_conv_kernel(x_ref, w1_ref, g1_ref, b1_ref, w2_ref, g2_ref, b2_ref,
                        out_ref, acc_ref, *, N, H, W):
    """Fused (conv3x3 -> BN(train) -> ReLU) x 2.

    x_ref  : (N, Cin_pad, H*W)   bf16 activations, spatial flattened on the lane axis
    w*_ref : (Cout_pad, 9*Cin_*) bf16 im2col-packed conv weights
    g*/b*  : (Cout_pad, 1)       f32 BN gamma / beta (channels on sublanes)
    out_ref: (N, Cout_pad, H*W)  f32
    acc_ref: (N, Cout_pad, H*W)  f32 VMEM scratch (pre-BN conv accumulator, reused)
    """
    HW = H * W
    f32 = jnp.float32
    bf16 = jnp.bfloat16
    Cpad = out_ref.shape[1]
    inv_cnt = 1.0 / float(N * HW)

    # Lane-position masks for kw shifts that would wrap across image rows (hoisted,
    # built once, kept in bf16 so tap*mask stays in the matmul input dtype).
    wcol = lax.broadcasted_iota(jnp.int32, (1, HW), 1) % W
    mask_dw = {
        -1: (wcol >= 1).astype(bf16),      # source column w-1 must be >= 0
        0: None,
        1: (wcol <= W - 2).astype(bf16),   # source column w+1 must be <= W-1
    }

    def im2col(x):
        """(C, HW) bf16 -> (9*C, HW) bf16 patches (taps kh-major/kw-minor, channel-minor).
        Vertical (kh) zero padding is handled by the zero-extended ends of xe; horizontal
        row-wrap is zeroed by the dw lane masks.  C is a multiple of 8, so the axis-0
        concat pieces are sublane-tile aligned."""
        C = x.shape[0]
        zpad = jnp.zeros((C, W + 1), bf16)
        xe = jnp.concatenate([zpad, x, zpad], axis=-1)        # (C, HW + 2W + 2)
        base = W + 1
        taps = []
        for kh in range(3):
            dh = kh - 1
            for kw in range(3):
                dw = kw - 1
                shift = dh * W + dw
                tap = xe[:, base + shift: base + shift + HW]  # static lane shift
                m = mask_dw[dw]
                if m is not None:
                    tap = tap * m                             # zero row-wrapped lanes
                taps.append(tap)
        return jnp.concatenate(taps, axis=0)                  # (9*C, HW)

    def bn_fold(s, sq, gamma, beta):
        """One-pass stats -> folded affine: y = acc*scale + bias (all f32)."""
        mean = s * inv_cnt
        var = jnp.maximum(sq * inv_cnt - mean * mean, 0.0)    # clamp f32 cancellation
        scale = gamma * lax.rsqrt(var + EPS)
        bias = beta - mean * scale
        return scale, bias

    zeros = jnp.zeros((Cpad, 1), f32)

    # ---- Stage 1: conv1 per batch element; keep pre-BN acc; accumulate sum/sumsq. ----
    def stage1_body(n, carry):
        s, sq = carry
        pat = im2col(x_ref[n])                                # (9*Cin_pad, HW) bf16
        acc = jnp.dot(w1_ref[...], pat, preferred_element_type=f32)  # (Cpad, HW) f32
        acc_ref[n] = acc
        return (s + jnp.sum(acc, axis=-1, keepdims=True),
                sq + jnp.sum(acc * acc, axis=-1, keepdims=True))

    s1, sq1 = lax.fori_loop(0, N, stage1_body, (zeros, zeros), unroll=True)
    scale1, bias1 = bn_fold(s1, sq1, g1_ref[...], b1_ref[...])

    # ---- Stage 2: BN1+ReLU -> conv2; overwrite the same scratch; accumulate stats. ----
    def stage2_body(n, carry):
        s, sq = carry
        y1 = jnp.maximum(acc_ref[n] * scale1 + bias1, 0.0)    # f32, folded BN + ReLU
        pat = im2col(y1.astype(bf16))                         # (9*Cpad, HW) bf16
        acc = jnp.dot(w2_ref[...], pat, preferred_element_type=f32)  # (Cpad, HW) f32
        acc_ref[n] = acc                                      # reuse scratch in place
        return (s + jnp.sum(acc, axis=-1, keepdims=True),
                sq + jnp.sum(acc * acc, axis=-1, keepdims=True))

    s2, sq2 = lax.fori_loop(0, N, stage2_body, (zeros, zeros), unroll=True)
    scale2, bias2 = bn_fold(s2, sq2, g2_ref[...], b2_ref[...])

    # ---- Stage 3: BN2 + ReLU, lane-dense stores (last dim = H*W, multiple of 128). ----
    def stage3_body(n, _):
        out_ref[n] = jnp.maximum(acc_ref[n] * scale2 + bias2, 0.0).astype(out_ref.dtype)
        return 0

    lax.fori_loop(0, N, stage3_body, 0, unroll=True)


def double_conv_forward(x_nchw, params, out_channels):
    """DoubleConv.forward. Input/output in PyTorch NCHW (f32); NCHW <-> (N, C, H*W)
    layout changes are free row-major reshapes; channel pad / bf16 cast are cheap
    wrapper-side plumbing."""
    N, Cin, H, W = x_nchw.shape
    HW = H * W
    Cpad = params["w1"].shape[0]
    Cin_pad = params["w1"].shape[1] // 9

    x = x_nchw.reshape(N, Cin, HW)
    if Cin_pad != Cin:
        x = jnp.pad(x, ((0, 0), (0, Cin_pad - Cin), (0, 0)))
    x = x.astype(jnp.bfloat16)                                # bf16 activation input I/O

    kernel = functools.partial(_double_conv_kernel, N=N, H=H, W=W)

    flops = 2 * N * HW * Cpad * 9 * (Cin_pad + Cpad)
    bytes_accessed = (N * Cin_pad * HW * 2 + N * Cpad * HW * 4
                      + params["w1"].size * 2 + params["w2"].size * 2)

    out = pl.pallas_call(
        kernel,
        out_shape=jax.ShapeDtypeStruct((N, Cpad, HW), jnp.float32),
        in_specs=[pl.BlockSpec(memory_space=pltpu.MemorySpace.VMEM)] * 7,
        out_specs=pl.BlockSpec(memory_space=pltpu.MemorySpace.VMEM),
        scratch_shapes=[pltpu.VMEM((N, Cpad, HW), jnp.float32)],
        compiler_params=pltpu.CompilerParams(vmem_limit_bytes=32 * 1024 * 1024),
        cost_estimate=pl.CostEstimate(flops=flops, transcendentals=0,
                                      bytes_accessed=bytes_accessed),
    )(x, params["w1"], params["gamma1"], params["beta1"],
      params["w2"], params["gamma2"], params["beta2"])

    return out[:, :out_channels, :].reshape(N, out_channels, H, W)


def init_double_conv_params(key, in_channels, out_channels):
    """Parameters in PyTorch layouts: conv weights (Cout, Cin, 3, 3); BN gamma=1, beta=0."""
    k1, k2 = jax.random.split(key)

    def conv_w(k, cin, cout):
        std = (2.0 / (cin * 9)) ** 0.5  # kaiming-like
        return jax.random.normal(k, (cout, cin, 3, 3), jnp.float32) * std

    return {
        "w1": conv_w(k1, in_channels, out_channels),
        "bn1_gamma": jnp.ones((out_channels,), jnp.float32),
        "bn1_beta": jnp.zeros((out_channels,), jnp.float32),
        "w2": conv_w(k2, out_channels, out_channels),
        "bn2_gamma": jnp.ones((out_channels,), jnp.float32),
        "bn2_beta": jnp.zeros((out_channels,), jnp.float32),
    }


def pack_params(p):
    """One-time repack of PyTorch-layout params into the kernel's layouts:
      * pad Cin/Cout to multiples of 8 sublanes,
      * conv (Cout, Cin, 3, 3) -> bf16 (Cout_pad, 9*Cin_pad) matching the im2col row
        order (tap kh-major/kw-minor, channel-minor),
      * BN vectors -> f32 (Cout_pad, 1) columns (pad gamma=1, beta=0 -> padded channels
        produce exact zeros through both stages)."""
    Cout, Cin = p["w1"].shape[0], p["w1"].shape[1]
    Cin_p, Cout_p = _round8(Cin), _round8(Cout)

    def pack_w(w, ci_p, co_p):
        co, ci = w.shape[0], w.shape[1]
        w = jnp.pad(w, ((0, co_p - co), (0, ci_p - ci), (0, 0), (0, 0)))
        return jnp.transpose(w, (0, 2, 3, 1)).reshape(co_p, 9 * ci_p).astype(jnp.bfloat16)

    def pad_col(v, co_p, fill):
        pad = jnp.full((co_p - v.shape[0],), fill, v.dtype)
        return jnp.concatenate([v, pad]).reshape(-1, 1)

    return {
        "w1": pack_w(p["w1"], Cin_p, Cout_p),
        "gamma1": pad_col(p["bn1_gamma"], Cout_p, 1.0),
        "beta1": pad_col(p["bn1_beta"], Cout_p, 0.0),
        "w2": pack_w(p["w2"], Cout_p, Cout_p),
        "gamma2": pad_col(p["bn2_gamma"], Cout_p, 1.0),
        "beta2": pad_col(p["bn2_beta"], Cout_p, 0.0),
    }


def reference_double_conv(x, torch_params):
    """Pure-JAX f32 reference (matches nn.Sequential in the PyTorch module, training mode)."""
    def stage(x, w, gamma, beta):
        y = lax.conv_general_dilated(
            x, w, window_strides=(1, 1), padding=((1, 1), (1, 1)),
            dimension_numbers=("NCHW", "OIHW", "NCHW"))
        mean = jnp.mean(y, axis=(0, 2, 3), keepdims=True)
        var = jnp.mean((y - mean) ** 2, axis=(0, 2, 3), keepdims=True)
        y = (y - mean) * lax.rsqrt(var + EPS)
        y = y * gamma.reshape(1, -1, 1, 1) + beta.reshape(1, -1, 1, 1)
        return jnp.maximum(y, 0.0)

    y = stage(x, torch_params["w1"], torch_params["bn1_gamma"], torch_params["bn1_beta"])
    return stage(y, torch_params["w2"], torch_params["bn2_gamma"], torch_params["bn2_beta"])


if __name__ == "__main__":
    key = jax.random.PRNGKey(0)
    kx, kp = jax.random.split(key)

    N, Cin, H, W = 2, 4, 16, 16
    Cout = 8

    x = jax.random.normal(kx, (N, Cin, H, W), jnp.float32)
    torch_params = init_double_conv_params(kp, Cin, Cout)
    params = pack_params(torch_params)

    fwd = jax.jit(double_conv_forward, static_argnames=("out_channels",))
    out = jax.block_until_ready(fwd(x, params, out_channels=Cout))

    assert out.shape == (N, Cout, H, W), out.shape
    assert bool(jnp.all(jnp.isfinite(out)))
    assert bool(jnp.all(out >= 0.0))  # ReLU output

    # Loose correctness check vs the f32 reference (kernel matmul inputs are bf16,
    # which feeds the BatchNorm statistics -> same tolerance as the validated version).
    ref = reference_double_conv(x, torch_params)
    max_err = float(jnp.max(jnp.abs(out - ref)))
    mean_err = float(jnp.mean(jnp.abs(out - ref)))
    assert max_err < 0.5 and mean_err < 0.05, (max_err, mean_err)

    print("KERNEL_OK")
</pallas_src>

<mosaic_0001>
module attributes {stable_mosaic.version = 11 : i64} {
  func.func @_double_conv_kernel(%arg0: memref<2x8x256xbf16, #tpu.memory_space<vmem>>, %arg1: memref<8x72xbf16, #tpu.memory_space<vmem>>, %arg2: memref<8x1xf32, #tpu.memory_space<vmem>>, %arg3: memref<8x1xf32, #tpu.memory_space<vmem>>, %arg4: memref<8x72xbf16, #tpu.memory_space<vmem>>, %arg5: memref<8x1xf32, #tpu.memory_space<vmem>>, %arg6: memref<8x1xf32, #tpu.memory_space<vmem>>, %arg7: memref<2x8x256xf32, #tpu.memory_space<vmem>>, %arg8: memref<2x8x256xf32, #tpu.memory_space<vmem>>) attributes {dimension_semantics = [], scalar_prefetch = 0 : i64, scratch_operands = 1 : i64, tpu.core_type = #tpu.core_type<tc>} {
    %0 = tpu.iota {dimensions = array<i32: 1>} : vector<1x256xi32>
    %c16_i32 = arith.constant 16 : i32
    %c0_i32 = arith.constant 0 : i32
    %1 = arith.cmpi eq, %c16_i32, %c0_i32 : i32
    %c1_i32 = arith.constant 1 : i32
    %2 = arith.select %1, %c1_i32, %c16_i32 : i32
    %3 = vector.broadcast %2 : i32 to vector<1x256xi32>
    %4 = arith.remsi %0, %3 : vector<1x256xi32>
    %c0_i32_0 = arith.constant 0 : i32
    %5 = vector.broadcast %c0_i32_0 : i32 to vector<1x256xi32>
    %6 = arith.cmpi ne, %4, %5 : vector<1x256xi32>
    %c0_i32_1 = arith.constant 0 : i32
    %7 = vector.broadcast %c0_i32_1 : i32 to vector<1x256xi32>
    %8 = arith.cmpi slt, %4, %7 : vector<1x256xi32>
    %c0_i32_2 = arith.constant 0 : i32
    %9 = arith.cmpi slt, %2, %c0_i32_2 : i32
    %10 = vector.broadcast %9 : i1 to vector<1x256xi1>
    %11 = vector.broadcast %10 : vector<1x256xi1> to vector<1x256xi1>
    %12 = arith.xori %8, %11 : vector<1x256xi1>
    %13 = arith.andi %12, %6 : vector<1x256xi1>
    %14 = vector.broadcast %2 : i32 to vector<1x256xi32>
    %15 = arith.addi %4, %14 : vector<1x256xi32>
    %16 = arith.select %13, %15, %4 : vector<1x256xi1>, vector<1x256xi32>
    %c1_i32_3 = arith.constant 1 : i32
    %17 = vector.broadcast %c1_i32_3 : i32 to vector<1x256xi32>
    %18 = arith.cmpi sge, %16, %17 : vector<1x256xi32>
    %19 = arith.extui %18 : vector<1x256xi1> to vector<1x256xi32>
    %20 = arith.sitofp %19 : vector<1x256xi32> to vector<1x256xf32>
    %21 = arith.truncf %20 : vector<1x256xf32> to vector<1x256xbf16>
    %c14_i32 = arith.constant 14 : i32
    %22 = vector.broadcast %c14_i32 : i32 to vector<1x256xi32>
    %23 = arith.cmpi sle, %16, %22 : vector<1x256xi32>
    %24 = arith.extui %23 : vector<1x256xi1> to vector<1x256xi32>
    %25 = arith.sitofp %24 : vector<1x256xi32> to vector<1x256xf32>
    %26 = arith.truncf %25 : vector<1x256xf32> to vector<1x256xbf16>
    %cst = arith.constant 0.000000e+00 : f32
    %27 = vector.broadcast %cst : f32 to vector<8x1xf32>
    %c0_i32_4 = arith.constant 0 : i32
    %28 = arith.index_cast %c0_i32_4 : i32 to index
    %c0 = arith.constant 0 : index
    %c0_5 = arith.constant 0 : index
    %29 = vector.load %arg0[%28, %c0, %c0_5] : memref<2x8x256xbf16, #tpu.memory_space<vmem>>, vector<1x8x256xbf16>
    %30 = vector.shape_cast %29 : vector<1x8x256xbf16> to vector<8x256xbf16>
    %cst_6 = arith.constant 0.000000e+00 : bf16
    %31 = vector.broadcast %cst_6 : bf16 to vector<8x17xbf16>
    %32 = tpu.concatenate %31, %30, %31 in 1 : vector<8x17xbf16>, vector<8x256xbf16>, vector<8x17xbf16> -> vector<8x290xbf16>
    %33 = vector.extract_strided_slice %32 {offsets = [0, 0], sizes = [8, 256], strides = [1, 1]} : vector<8x290xbf16> to vector<8x256xbf16>
    %34 = vector.broadcast %21 : vector<1x256xbf16> to vector<8x256xbf16>
    %35 = arith.mulf %33, %34 : vector<8x256xbf16>
    %36 = vector.extract_strided_slice %32 {offsets = [0, 1], sizes = [8, 256], strides = [1, 1]} : vector<8x290xbf16> to vector<8x256xbf16>
    %37 = vector.extract_strided_slice %32 {offsets = [0, 2], sizes = [8, 256], strides = [1, 1]} : vector<8x290xbf16> to vector<8x256xbf16>
    %38 = vector.broadcast %26 : vector<1x256xbf16> to vector<8x256xbf16>
    %39 = arith.mulf %37, %38 : vector<8x256xbf16>
    %40 = vector.extract_strided_slice %32 {offsets = [0, 16], sizes = [8, 256], strides = [1, 1]} : vector<8x290xbf16> to vector<8x256xbf16>
    %41 = vector.broadcast %21 : vector<1x256xbf16> to vector<8x256xbf16>
    %42 = arith.mulf %40, %41 : vector<8x256xbf16>
    %43 = vector.extract_strided_slice %32 {offsets = [0, 17], sizes = [8, 256], strides = [1, 1]} : vector<8x290xbf16> to vector<8x256xbf16>
    %44 = vector.extract_strided_slice %32 {offsets = [0, 18], sizes = [8, 256], strides = [1, 1]} : vector<8x290xbf16> to vector<8x256xbf16>
    %45 = vector.broadcast %26 : vector<1x256xbf16> to vector<8x256xbf16>
    %46 = arith.mulf %44, %45 : vector<8x256xbf16>
    %47 = vector.extract_strided_slice %32 {offsets = [0, 32], sizes = [8, 256], strides = [1, 1]} : vector<8x290xbf16> to vector<8x256xbf16>
    %48 = vector.broadcast %21 : vector<1x256xbf16> to vector<8x256xbf16>
    %49 = arith.mulf %47, %48 : vector<8x256xbf16>
    %50 = vector.extract_strided_slice %32 {offsets = [0, 33], sizes = [8, 256], strides = [1, 1]} : vector<8x290xbf16> to vector<8x256xbf16>
    %51 = vector.extract_strided_slice %32 {offsets = [0, 34], sizes = [8, 256], strides = [1, 1]} : vector<8x290xbf16> to vector<8x256xbf16>
    %52 = vector.broadcast %26 : vector<1x256xbf16> to vector<8x256xbf16>
    %53 = arith.mulf %51, %52 : vector<8x256xbf16>
    %54 = tpu.concatenate %35, %36, %39, %42, %43, %46, %49, %50, %53 in 0 : vector<8x256xbf16>, vector<8x256xbf16>, vector<8x256xbf16>, vector<8x256xbf16>, vector<8x256xbf16>, vector<8x256xbf16>, vector<8x256xbf16>, vector<8x256xbf16>, vector<8x256xbf16> -> vector<72x256xbf16>
    %c0_7 = arith.constant 0 : index
    %c0_8 = arith.constant 0 : index
    %55 = vector.load %arg1[%c0_7, %c0_8] : memref<8x72xbf16, #tpu.memory_space<vmem>>, vector<8x72xbf16>
    %cst_9 = arith.constant dense<0.000000e+00> : vector<8x256xf32>
    %56 = tpu.matmul %55, %54, %cst_9 {dimension_numbers = #tpu.dot_dimension_numbers<[1], [0], [0], [1], [0, 0, 1, 1], [], []>} : vector<8x72xbf16>, vector<72x256xbf16>, vector<8x256xf32> -> vector<8x256xf32>
    %57 = arith.index_cast %c0_i32_4 : i32 to index
    %c0_10 = arith.constant 0 : index
    %c0_11 = arith.constant 0 : index
    %58 = vector.load %arg8[%57, %c0_10, %c0_11] : memref<2x8x256xf32, #tpu.memory_space<vmem>>, vector<1x8x256xf32>
    %59 = vector.shape_cast %58 : vector<1x8x256xf32> to vector<8x256xf32>
    %60 = vector.shape_cast %56 : vector<8x256xf32> to vector<1x8x256xf32>
    tpu.vector_store %arg8[%57, %c0_10, %c0_11], %60 {strides = array<i32>} : memref<2x8x256xf32, #tpu.memory_space<vmem>>, vector<1x8x256xf32>,
    %cst_12 = arith.constant dense<0.000000e+00> : vector<8xf32>
    %61 = vector.multi_reduction <add>, %56, %cst_12 [1] : vector<8x256xf32> to vector<8xf32>
    %62 = vector.shape_cast %61 : vector<8xf32> to vector<8x1xf32>
    %63 = arith.addf %27, %62 : vector<8x1xf32>
    %64 = arith.mulf %56, %56 : vector<8x256xf32>
    %cst_13 = arith.constant dense<0.000000e+00> : vector<8xf32>
    %65 = vector.multi_reduction <add>, %64, %cst_13 [1] : vector<8x256xf32> to vector<8xf32>
    %66 = vector.shape_cast %65 : vector<8xf32> to vector<8x1xf32>
    %67 = arith.addf %27, %66 : vector<8x1xf32>
    %c1_i32_14 = arith.constant 1 : i32
    %68 = arith.index_cast %c1_i32_14 : i32 to index
    %c0_15 = arith.constant 0 : index
    %c0_16 = arith.constant 0 : index
    %69 = vector.load %arg0[%68, %c0_15, %c0_16] : memref<2x8x256xbf16, #tpu.memory_space<vmem>>, vector<1x8x256xbf16>
    %70 = vector.shape_cast %69 : vector<1x8x256xbf16> to vector<8x256xbf16>
    %cst_17 = arith.constant 0.000000e+00 : bf16
    %71 = vector.broadcast %cst_17 : bf16 to vector<8x17xbf16>
    %72 = tpu.concatenate %71, %70, %71 in 1 : vector<8x17xbf16>, vector<8x256xbf16>, vector<8x17xbf16> -> vector<8x290xbf16>
    %73 = vector.extract_strided_slice %72 {offsets = [0, 0], sizes = [8, 256], strides = [1, 1]} : vector<8x290xbf16> to vector<8x256xbf16>
    %74 = vector.broadcast %21 : vector<1x256xbf16> to vector<8x256xbf16>
    %75 = arith.mulf %73, %74 : vector<8x256xbf16>
    %76 = vector.extract_strided_slice %72 {offsets = [0, 1], sizes = [8, 256], strides = [1, 1]} : vector<8x290xbf16> to vector<8x256xbf16>
    %77 = vector.extract_strided_slice %72 {offsets = [0, 2], sizes = [8, 256], strides = [1, 1]} : vector<8x290xbf16> to vector<8x256xbf16>
    %78 = vector.broadcast %26 : vector<1x256xbf16> to vector<8x256xbf16>
    %79 = arith.mulf %77, %78 : vector<8x256xbf16>
    %80 = vector.extract_strided_slice %72 {offsets = [0, 16], sizes = [8, 256], strides = [1, 1]} : vector<8x290xbf16> to vector<8x256xbf16>
    %81 = vector.broadcast %21 : vector<1x256xbf16> to vector<8x256xbf16>
    %82 = arith.mulf %80, %81 : vector<8x256xbf16>
    %83 = vector.extract_strided_slice %72 {offsets = [0, 17], sizes = [8, 256], strides = [1, 1]} : vector<8x290xbf16> to vector<8x256xbf16>
    %84 = vector.extract_strided_slice %72 {offsets = [0, 18], sizes = [8, 256], strides = [1, 1]} : vector<8x290xbf16> to vector<8x256xbf16>
    %85 = vector.broadcast %26 : vector<1x256xbf16> to vector<8x256xbf16>
    %86 = arith.mulf %84, %85 : vector<8x256xbf16>
    %87 = vector.extract_strided_slice %72 {offsets = [0, 32], sizes = [8, 256], strides = [1, 1]} : vector<8x290xbf16> to vector<8x256xbf16>
    %88 = vector.broadcast %21 : vector<1x256xbf16> to vector<8x256xbf16>
    %89 = arith.mulf %87, %88 : vector<8x256xbf16>
    %90 = vector.extract_strided_slice %72 {offsets = [0, 33], sizes = [8, 256], strides = [1, 1]} : vector<8x290xbf16> to vector<8x256xbf16>
    %91 = vector.extract_strided_slice %72 {offsets = [0, 34], sizes = [8, 256], strides = [1, 1]} : vector<8x290xbf16> to vector<8x256xbf16>
    %92 = vector.broadcast %26 : vector<1x256xbf16> to vector<8x256xbf16>
    %93 = arith.mulf %91, %92 : vector<8x256xbf16>
    %94 = tpu.concatenate %75, %76, %79, %82, %83, %86, %89, %90, %93 in 0 : vector<8x256xbf16>, vector<8x256xbf16>, vector<8x256xbf16>, vector<8x256xbf16>, vector<8x256xbf16>, vector<8x256xbf16>, vector<8x256xbf16>, vector<8x256xbf16>, vector<8x256xbf16> -> vector<72x256xbf16>
    %c0_18 = arith.constant 0 : index
    %c0_19 = arith.constant 0 : index
    %95 = vector.load %arg1[%c0_18, %c0_19] : memref<8x72xbf16, #tpu.memory_space<vmem>>, vector<8x72xbf16>
    %cst_20 = arith.constant dense<0.000000e+00> : vector<8x256xf32>
    %96 = tpu.matmul %95, %94, %cst_20 {dimension_numbers = #tpu.dot_dimension_numbers<[1], [0], [0], [1], [0, 0, 1, 1], [], []>} : vector<8x72xbf16>, vector<72x256xbf16>, vector<8x256xf32> -> vector<8x256xf32>
    %97 = arith.index_cast %c1_i32_14 : i32 to index
    %c0_21 = arith.constant 0 : index
    %c0_22 = arith.constant 0 : index
    %98 = vector.load %arg8[%97, %c0_21, %c0_22] : memref<2x8x256xf32, #tpu.memory_space<vmem>>, vector<1x8x256xf32>
    %99 = vector.shape_cast %98 : vector<1x8x256xf32> to vector<8x256xf32>
    %100 = vector.shape_cast %96 : vector<8x256xf32> to vector<1x8x256xf32>
    tpu.vector_store %arg8[%97, %c0_21, %c0_22], %100 {strides = array<i32>} : memref<2x8x256xf32, #tpu.memory_space<vmem>>, vector<1x8x256xf32>,
    %cst_23 = arith.constant dense<0.000000e+00> : vector<8xf32>
    %101 = vector.multi_reduction <add>, %96, %cst_23 [1] : vector<8x256xf32> to vector<8xf32>
    %102 = vector.shape_cast %101 : vector<8xf32> to vector<8x1xf32>
    %103 = arith.addf %63, %102 : vector<8x1xf32>
    %104 = arith.mulf %96, %96 : vector<8x256xf32>
    %cst_24 = arith.constant dense<0.000000e+00> : vector<8xf32>
    %105 = vector.multi_reduction <add>, %104, %cst_24 [1] : vector<8x256xf32> to vector<8xf32>
    %106 = vector.shape_cast %105 : vector<8xf32> to vector<8x1xf32>
    %107 = arith.addf %67, %106 : vector<8x1xf32>
    %c2_i32 = arith.constant 2 : i32
    %c0_25 = arith.constant 0 : index
    %c0_26 = arith.constant 0 : index
    %108 = vector.load %arg2[%c0_25, %c0_26] : memref<8x1xf32, #tpu.memory_space<vmem>>, vector<8x1xf32>
    %c0_27 = arith.constant 0 : index
    %c0_28 = arith.constant 0 : index
    %109 = vector.load %arg3[%c0_27, %c0_28] : memref<8x1xf32, #tpu.memory_space<vmem>>, vector<8x1xf32>
    %cst_29 = arith.constant 0.001953125 : f32
    %110 = vector.broadcast %cst_29 : f32 to vector<8x1xf32>
    %111 = arith.mulf %103, %110 : vector<8x1xf32>
    %cst_30 = arith.constant 0.001953125 : f32
    %112 = vector.broadcast %cst_30 : f32 to vector<8x1xf32>
    %113 = arith.mulf %107, %112 : vector<8x1xf32>
    %114 = arith.mulf %111, %111 : vector<8x1xf32>
    %115 = arith.subf %113, %114 : vector<8x1xf32>
    %cst_31 = arith.constant 0.000000e+00 : f32
    %116 = vector.broadcast %cst_31 : f32 to vector<8x1xf32>
    %117 = arith.maximumf %115, %116 : vector<8x1xf32>
    %cst_32 = arith.constant 9.99999974E-6 : f32
    %118 = vector.broadcast %cst_32 : f32 to vector<8x1xf32>
    %119 = arith.addf %117, %118 : vector<8x1xf32>
    %120 = math.rsqrt %119 : vector<8x1xf32>
    %121 = arith.mulf %108, %120 : vector<8x1xf32>
    %122 = arith.mulf %111, %121 : vector<8x1xf32>
    %123 = arith.subf %109, %122 : vector<8x1xf32>
    %c0_i32_33 = arith.constant 0 : i32
    %124 = arith.index_cast %c0_i32_33 : i32 to index
    %c0_34 = arith.constant 0 : index
    %c0_35 = arith.constant 0 : index
    %125 = vector.load %arg8[%124, %c0_34, %c0_35] : memref<2x8x256xf32, #tpu.memory_space<vmem>>, vector<1x8x256xf32>
    %126 = vector.shape_cast %125 : vector<1x8x256xf32> to vector<8x256xf32>
    %127 = vector.broadcast %121 : vector<8x1xf32> to vector<8x256xf32>
    %128 = arith.mulf %126, %127 : vector<8x256xf32>
    %129 = vector.broadcast %123 : vector<8x1xf32> to vector<8x256xf32>
    %130 = arith.addf %128, %129 : vector<8x256xf32>
    %cst_36 = arith.constant 0.000000e+00 : f32
    %131 = vector.broadcast %cst_36 : f32 to vector<8x256xf32>
    %132 = arith.maximumf %130, %131 : vector<8x256xf32>
    %133 = arith.truncf %132 : vector<8x256xf32> to vector<8x256xbf16>
    %cst_37 = arith.constant 0.000000e+00 : bf16
    %134 = vector.broadcast %cst_37 : bf16 to vector<8x17xbf16>
    %135 = tpu.concatenate %134, %133, %134 in 1 : vector<8x17xbf16>, vector<8x256xbf16>, vector<8x17xbf16> -> vector<8x290xbf16>
    %136 = vector.extract_strided_slice %135 {offsets = [0, 0], sizes = [8, 256], strides = [1, 1]} : vector<8x290xbf16> to vector<8x256xbf16>
    %137 = vector.broadcast %21 : vector<1x256xbf16> to vector<8x256xbf16>
    %138 = arith.mulf %136, %137 : vector<8x256xbf16>
    %139 = vector.extract_strided_slice %135 {offsets = [0, 1], sizes = [8, 256], strides = [1, 1]} : vector<8x290xbf16> to vector<8x256xbf16>
    %140 = vector.extract_strided_slice %135 {offsets = [0, 2], sizes = [8, 256], strides = [1, 1]} : vector<8x290xbf16> to vector<8x256xbf16>
    %141 = vector.broadcast %26 : vector<1x256xbf16> to vector<8x256xbf16>
    %142 = arith.mulf %140, %141 : vector<8x256xbf16>
    %143 = vector.extract_strided_slice %135 {offsets = [0, 16], sizes = [8, 256], strides = [1, 1]} : vector<8x290xbf16> to vector<8x256xbf16>
    %144 = vector.broadcast %21 : vector<1x256xbf16> to vector<8x256xbf16>
    %145 = arith.mulf %143, %144 : vector<8x256xbf16>
    %146 = vector.extract_strided_slice %135 {offsets = [0, 17], sizes = [8, 256], strides = [1, 1]} : vector<8x290xbf16> to vector<8x256xbf16>
    %147 = vector.extract_strided_slice %135 {offsets = [0, 18], sizes = [8, 256], strides = [1, 1]} : vector<8x290xbf16> to vector<8x256xbf16>
    %148 = vector.broadcast %26 : vector<1x256xbf16> to vector<8x256xbf16>
    %149 = arith.mulf %147, %148 : vector<8x256xbf16>
    %150 = vector.extract_strided_slice %135 {offsets = [0, 32], sizes = [8, 256], strides = [1, 1]} : vector<8x290xbf16> to vector<8x256xbf16>
    %151 = vector.broadcast %21 : vector<1x256xbf16> to vector<8x256xbf16>
    %152 = arith.mulf %150, %151 : vector<8x256xbf16>
    %153 = vector.extract_strided_slice %135 {offsets = [0, 33], sizes = [8, 256], strides = [1, 1]} : vector<8x290xbf16> to vector<8x256xbf16>
    %154 = vector.extract_strided_slice %135 {offsets = [0, 34], sizes = [8, 256], strides = [1, 1]} : vector<8x290xbf16> to vector<8x256xbf16>
    %155 = vector.broadcast %26 : vector<1x256xbf16> to vector<8x256xbf16>
    %156 = arith.mulf %154, %155 : vector<8x256xbf16>
    %157 = tpu.concatenate %138, %139, %142, %145, %146, %149, %152, %153, %156 in 0 : vector<8x256xbf16>, vector<8x256xbf16>, vector<8x256xbf16>, vector<8x256xbf16>, vector<8x256xbf16>, vector<8x256xbf16>, vector<8x256xbf16>, vector<8x256xbf16>, vector<8x256xbf16> -> vector<72x256xbf16>
    %c0_38 = arith.constant 0 : index
    %c0_39 = arith.constant 0 : index
    %158 = vector.load %arg4[%c0_38, %c0_39] : memref<8x72xbf16, #tpu.memory_space<vmem>>, vector<8x72xbf16>
    %cst_40 = arith.constant dense<0.000000e+00> : vector<8x256xf32>
    %159 = tpu.matmul %158, %157, %cst_40 {dimension_numbers = #tpu.dot_dimension_numbers<[1], [0], [0], [1], [0, 0, 1, 1], [], []>} : vector<8x72xbf16>, vector<72x256xbf16>, vector<8x256xf32> -> vector<8x256xf32>
    %160 = arith.index_cast %c0_i32_33 : i32 to index
    %c0_41 = arith.constant 0 : index
    %c0_42 = arith.constant 0 : index
    %161 = vector.load %arg8[%160, %c0_41, %c0_42] : memref<2x8x256xf32, #tpu.memory_space<vmem>>, vector<1x8x256xf32>
    %162 = vector.shape_cast %161 : vector<1x8x256xf32> to vector<8x256xf32>
    %163 = vector.shape_cast %159 : vector<8x256xf32> to vector<1x8x256xf32>
    tpu.vector_store %arg8[%160, %c0_41, %c0_42], %163 {strides = array<i32>} : memref<2x8x256xf32, #tpu.memory_space<vmem>>, vector<1x8x256xf32>,
    %cst_43 = arith.constant dense<0.000000e+00> : vector<8xf32>
    %164 = vector.multi_reduction <add>, %159, %cst_43 [1] : vector<8x256xf32> to vector<8xf32>
    %165 = vector.shape_cast %164 : vector<8xf32> to vector<8x1xf32>
    %166 = arith.addf %27, %165 : vector<8x1xf32>
    %167 = arith.mulf %159, %159 : vector<8x256xf32>
    %cst_44 = arith.constant dense<0.000000e+00> : vector<8xf32>
    %168 = vector.multi_reduction <add>, %167, %cst_44 [1] : vector<8x256xf32> to vector<8xf32>
    %169 = vector.shape_cast %168 : vector<8xf32> to vector<8x1xf32>
    %170 = arith.addf %27, %169 : vector<8x1xf32>
    %c1_i32_45 = arith.constant 1 : i32
    %171 = arith.index_cast %c1_i32_45 : i32 to index
    %c0_46 = arith.constant 0 : index
    %c0_47 = arith.constant 0 : index
    %172 = vector.load %arg8[%171, %c0_46, %c0_47] : memref<2x8x256xf32, #tpu.memory_space<vmem>>, vector<1x8x256xf32>
    %173 = vector.shape_cast %172 : vector<1x8x256xf32> to vector<8x256xf32>
    %174 = vector.broadcast %121 : vector<8x1xf32> to vector<8x256xf32>
    %175 = arith.mulf %173, %174 : vector<8x256xf32>
    %176 = vector.broadcast %123 : vector<8x1xf32> to vector<8x256xf32>
    %177 = arith.addf %175, %176 : vector<8x256xf32>
    %cst_48 = arith.constant 0.000000e+00 : f32
    %178 = vector.broadcast %cst_48 : f32 to vector<8x256xf32>
    %179 = arith.maximumf %177, %178 : vector<8x256xf32>
    %180 = arith.truncf %179 : vector<8x256xf32> to vector<8x256xbf16>
    %cst_49 = arith.constant 0.000000e+00 : bf16
    %181 = vector.broadcast %cst_49 : bf16 to vector<8x17xbf16>
    %182 = tpu.concatenate %181, %180, %181 in 1 : vector<8x17xbf16>, vector<8x256xbf16>, vector<8x17xbf16> -> vector<8x290xbf16>
    %183 = vector.extract_strided_slice %182 {offsets = [0, 0], sizes = [8, 256], strides = [1, 1]} : vector<8x290xbf16> to vector<8x256xbf16>
    %184 = vector.broadcast %21 : vector<1x256xbf16> to vector<8x256xbf16>
    %185 = arith.mulf %183, %184 : vector<8x256xbf16>
    %186 = vector.extract_strided_slice %182 {offsets = [0, 1], sizes = [8, 256], strides = [1, 1]} : vector<8x290xbf16> to vector<8x256xbf16>
    %187 = vector.extract_strided_slice %182 {offsets = [0, 2], sizes = [8, 256], strides = [1, 1]} : vector<8x290xbf16> to vector<8x256xbf16>
    %188 = vector.broadcast %26 : vector<1x256xbf16> to vector<8x256xbf16>
    %189 = arith.mulf %187, %188 : vector<8x256xbf16>
    %190 = vector.extract_strided_slice %182 {offsets = [0, 16], sizes = [8, 256], strides = [1, 1]} : vector<8x290xbf16> to vector<8x256xbf16>
    %191 = vector.broadcast %21 : vector<1x256xbf16> to vector<8x256xbf16>
    %192 = arith.mulf %190, %191 : vector<8x256xbf16>
    %193 = vector.extract_strided_slice %182 {offsets = [0, 17], sizes = [8, 256], strides = [1, 1]} : vector<8x290xbf16> to vector<8x256xbf16>
    %194 = vector.extract_strided_slice %182 {offsets = [0, 18], sizes = [8, 256], strides = [1, 1]} : vector<8x290xbf16> to vector<8x256xbf16>
    %195 = vector.broadcast %26 : vector<1x256xbf16> to vector<8x256xbf16>
    %196 = arith.mulf %194, %195 : vector<8x256xbf16>
    %197 = vector.extract_strided_slice %182 {offsets = [0, 32], sizes = [8, 256], strides = [1, 1]} : vector<8x290xbf16> to vector<8x256xbf16>
    %198 = vector.broadcast %21 : vector<1x256xbf16> to vector<8x256xbf16>
    %199 = arith.mulf %197, %198 : vector<8x256xbf16>
    %200 = vector.extract_strided_slice %182 {offsets = [0, 33], sizes = [8, 256], strides = [1, 1]} : vector<8x290xbf16> to vector<8x256xbf16>
    %201 = vector.extract_strided_slice %182 {offsets = [0, 34], sizes = [8, 256], strides = [1, 1]} : vector<8x290xbf16> to vector<8x256xbf16>
    %202 = vector.broadcast %26 : vector<1x256xbf16> to vector<8x256xbf16>
    %203 = arith.mulf %201, %202 : vector<8x256xbf16>
    %204 = tpu.concatenate %185, %186, %189, %192, %193, %196, %199, %200, %203 in 0 : vector<8x256xbf16>, vector<8x256xbf16>, vector<8x256xbf16>, vector<8x256xbf16>, vector<8x256xbf16>, vector<8x256xbf16>, vector<8x256xbf16>, vector<8x256xbf16>, vector<8x256xbf16> -> vector<72x256xbf16>
    %c0_50 = arith.constant 0 : index
    %c0_51 = arith.constant 0 : index
    %205 = vector.load %arg4[%c0_50, %c0_51] : memref<8x72xbf16, #tpu.memory_space<vmem>>, vector<8x72xbf16>
    %cst_52 = arith.constant dense<0.000000e+00> : vector<8x256xf32>
    %206 = tpu.matmul %205, %204, %cst_52 {dimension_numbers = #tpu.dot_dimension_numbers<[1], [0], [0], [1], [0, 0, 1, 1], [], []>} : vector<8x72xbf16>, vector<72x256xbf16>, vector<8x256xf32> -> vector<8x256xf32>
    %207 = arith.index_cast %c1_i32_45 : i32 to index
    %c0_53 = arith.constant 0 : index
    %c0_54 = arith.constant 0 : index
    %208 = vector.load %arg8[%207, %c0_53, %c0_54] : memref<2x8x256xf32, #tpu.memory_space<vmem>>, vector<1x8x256xf32>
    %209 = vector.shape_cast %208 : vector<1x8x256xf32> to vector<8x256xf32>
    %210 = vector.shape_cast %206 : vector<8x256xf32> to vector<1x8x256xf32>
    tpu.vector_store %arg8[%207, %c0_53, %c0_54], %210 {strides = array<i32>} : memref<2x8x256xf32, #tpu.memory_space<vmem>>, vector<1x8x256xf32>,
    %cst_55 = arith.constant dense<0.000000e+00> : vector<8xf32>
    %211 = vector.multi_reduction <add>, %206, %cst_55 [1] : vector<8x256xf32> to vector<8xf32>
    %212 = vector.shape_cast %211 : vector<8xf32> to vector<8x1xf32>
    %213 = arith.addf %166, %212 : vector<8x1xf32>
    %214 = arith.mulf %206, %206 : vector<8x256xf32>
    %cst_56 = arith.constant dense<0.000000e+00> : vector<8xf32>
    %215 = vector.multi_reduction <add>, %214, %cst_56 [1] : vector<8x256xf32> to vector<8xf32>
    %216 = vector.shape_cast %215 : vector<8xf32> to vector<8x1xf32>
    %217 = arith.addf %170, %216 : vector<8x1xf32>
    %c2_i32_57 = arith.constant 2 : i32
    %c0_58 = arith.constant 0 : index
    %c0_59 = arith.constant 0 : index
    %218 = vector.load %arg5[%c0_58, %c0_59] : memref<8x1xf32, #tpu.memory_space<vmem>>, vector<8x1xf32>
    %c0_60 = arith.constant 0 : index
    %c0_61 = arith.constant 0 : index
    %219 = vector.load %arg6[%c0_60, %c0_61] : memref<8x1xf32, #tpu.memory_space<vmem>>, vector<8x1xf32>
    %cst_62 = arith.constant 0.001953125 : f32
    %220 = vector.broadcast %cst_62 : f32 to vector<8x1xf32>
    %221 = arith.mulf %213, %220 : vector<8x1xf32>
    %cst_63 = arith.constant 0.001953125 : f32
    %222 = vector.broadcast %cst_63 : f32 to vector<8x1xf32>
    %223 = arith.mulf %217, %222 : vector<8x1xf32>
    %224 = arith.mulf %221, %221 : vector<8x1xf32>
    %225 = arith.subf %223, %224 : vector<8x1xf32>
    %cst_64 = arith.constant 0.000000e+00 : f32
    %226 = vector.broadcast %cst_64 : f32 to vector<8x1xf32>
    %227 = arith.maximumf %225, %226 : vector<8x1xf32>
    %cst_65 = arith.constant 9.99999974E-6 : f32
    %228 = vector.broadcast %cst_65 : f32 to vector<8x1xf32>
    %229 = arith.addf %227, %228 : vector<8x1xf32>
    %230 = math.rsqrt %229 : vector<8x1xf32>
    %231 = arith.mulf %218, %230 : vector<8x1xf32>
    %232 = arith.mulf %221, %231 : vector<8x1xf32>
    %233 = arith.subf %219, %232 : vector<8x1xf32>
    %c0_i32_66 = arith.constant 0 : i32
    %234 = arith.index_cast %c0_i32_66 : i32 to index
    %c0_67 = arith.constant 0 : index
    %c0_68 = arith.constant 0 : index
    %235 = vector.load %arg8[%234, %c0_67, %c0_68] : memref<2x8x256xf32, #tpu.memory_space<vmem>>, vector<1x8x256xf32>
    %236 = vector.shape_cast %235 : vector<1x8x256xf32> to vector<8x256xf32>
    %237 = vector.broadcast %231 : vector<8x1xf32> to vector<8x256xf32>
    %238 = arith.mulf %236, %237 : vector<8x256xf32>
    %239 = vector.broadcast %233 : vector<8x1xf32> to vector<8x256xf32>
    %240 = arith.addf %238, %239 : vector<8x256xf32>
    %cst_69 = arith.constant 0.000000e+00 : f32
    %241 = vector.broadcast %cst_69 : f32 to vector<8x256xf32>
    %242 = arith.maximumf %240, %241 : vector<8x256xf32>
    %243 = arith.index_cast %c0_i32_66 : i32 to index
    %c0_70 = arith.constant 0 : index
    %c0_71 = arith.constant 0 : index
    %244 = vector.load %arg7[%243, %c0_70, %c0_71] : memref<2x8x256xf32, #tpu.memory_space<vmem>>, vector<1x8x256xf32>
    %245 = vector.shape_cast %244 : vector<1x8x256xf32> to vector<8x256xf32>
    %246 = vector.shape_cast %242 : vector<8x256xf32> to vector<1x8x256xf32>
    tpu.vector_store %arg7[%243, %c0_70, %c0_71], %246 {strides = array<i32>} : memref<2x8x256xf32, #tpu.memory_space<vmem>>, vector<1x8x256xf32>,
    %c1_i32_72 = arith.constant 1 : i32
    %247 = arith.index_cast %c1_i32_72 : i32 to index
    %c0_73 = arith.constant 0 : index
    %c0_74 = arith.constant 0 : index
    %248 = vector.load %arg8[%247, %c0_73, %c0_74] : memref<2x8x256xf32, #tpu.memory_space<vmem>>, vector<1x8x256xf32>
    %249 = vector.shape_cast %248 : vector<1x8x256xf32> to vector<8x256xf32>
    %250 = vector.broadcast %231 : vector<8x1xf32> to vector<8x256xf32>
    %251 = arith.mulf %249, %250 : vector<8x256xf32>
    %252 = vector.broadcast %233 : vector<8x1xf32> to vector<8x256xf32>
    %253 = arith.addf %251, %252 : vector<8x256xf32>
    %cst_75 = arith.constant 0.000000e+00 : f32
    %254 = vector.broadcast %cst_75 : f32 to vector<8x256xf32>
    %255 = arith.maximumf %253, %254 : vector<8x256xf32>
    %256 = arith.index_cast %c1_i32_72 : i32 to index
    %c0_76 = arith.constant 0 : index
    %c0_77 = arith.constant 0 : index
    %257 = vector.load %arg7[%256, %c0_76, %c0_77] : memref<2x8x256xf32, #tpu.memory_space<vmem>>, vector<1x8x256xf32>
    %258 = vector.shape_cast %257 : vector<1x8x256xf32> to vector<8x256xf32>
    %259 = vector.shape_cast %255 : vector<8x256xf32> to vector<1x8x256xf32>
    tpu.vector_store %arg7[%256, %c0_76, %c0_77], %259 {strides = array<i32>} : memref<2x8x256xf32, #tpu.memory_space<vmem>>, vector<1x8x256xf32>,
    %c2_i32_78 = arith.constant 2 : i32
    return
  }
}

</mosaic_0001>

<bundles_post_ra>
// kernel: double_conv_forward.1
= control target key start
LH: loop header
LB: loop body
LE: loop exit
PB: predicated region body
PF: predicated region fallthrough
CT: control target
= control target key end

     0   :  { %v27_v0 = vlaneseq  ;;  %s1273_s28 = smov 17   ;;  %v1274_v14 = vmov 0.0   ;;  %s1276_s29 = smov 32   ;;  %vm78_vm4 = vcmask 138240   ;;  %vm163_vm5 = vcmask 277504   ;;  %s1910_s0 = inlined_call_operand.vmem [shape: bf16[2,8,256], index: 0, kind: input, shape index: {}]   ;;  %s1911_s1 = inlined_call_operand.vmem [shape: bf16[8,72], index: 1, kind: input, shape index: {}]   ;;  %s1912_s2 = inlined_call_operand.vmem [shape: f32[8,1], index: 2, kind: input, shape index: {}]   ;;  %s1913_s3 = inlined_call_operand.vmem [shape: f32[8,1], index: 3, kind: input, shape index: {}]   ;;  %s1914_s4 = inlined_call_operand.vmem [shape: bf16[8,72], index: 4, kind: input, shape index: {}]   ;;  %s1915_s5 = inlined_call_operand.vmem [shape: f32[8,1], index: 5, kind: input, shape index: {}]   ;;  %s1916_s6 = inlined_call_operand.vmem [shape: f32[8,1], index: 6, kind: input, shape index: {}]   ;;  %s1917_s7 = inlined_call_operand.vmem [shape: f32[2,8,256], index: 7, kind: output, shape index: {}]  }
   0x1   :  { %v1217_v1 = vld [vmem:[%s1910_s0 + $0x8] sm:$0xff]  ;;  %v68_v2 = vld [vmem:[%s1910_s0] sm:$0xff]  ;;  %s1275_s0 = smov 34   ;;  %s1277_s30 = smov 18   ;;  %vm149_vm6 = vcmask 261120   ;;  %vm135_vm7 = vcmask 146432  }
   0x2   :  { %v380_v3 = vunpack.c.l.b16 %v1217_v1  ;;  %v70_v4 = vunpack.c.l.b16 %v68_v2  ;;  %v28_v5 = vand.u32 127, %v27_v0  ;;  %v71_v6 = vunpack.c.h.b16 %v68_v2  ;;  %s1278_s8 = smov 2   ;;  %s1279_s9 = smov 16  }
   0x3   :  { %v381_v12 = vunpack.c.h.b16 %v1217_v1  ;;  %s1280_s10 = smov 111   ;;  %s1281_s11 = smov 95   ;;  %vm105_vm8 = vcmask 15360   ;;  %vm121_vm9 = vcmask 130048   ;;  %vm232_vm10 = vcmask 908288  }
   0x4   :  { %v382_v7 = vpack.c.b16 %v380_v3, %v380_v3  ;;  %v72_v8 = vpack.c.b16 %v70_v4, %v70_v4  ;;  %v29_v9 = vadd.s32 128, %v28_v5  ;;  %v34_v10 = vand.u32 15, %v28_v5  ;;  %s1282_s12 = smov 127   ;;  %s1283_s13 = smov 94  }
   0x5   :  { %v73_v11 = vpack.c.b16 %v71_v6, %v71_v6  ;;  %v383_v19 = vpack.c.b16 %v381_v12, %v381_v12  ;;  %s1284_s14 = smov 96   ;;  %s1285_s15 = smov 110   ;;  %vm292_vm11 = vcmask 769024   ;;  %vm295_vm12 = vcmask 1043456  }
   0x6   :  { %384 = vrot.lane.b32.xlu0 %v382_v7, %s1273_s28  ;;  %74 = vrot.lane.b32.xlu1 %v72_v8, %s1273_s28  ;;  %v41_v13 = vand.u32 15, %v29_v9  ;;  %vm54_vm0 = vcmp.ge.s32.totalorder %v34_v10, 1  ;;  %vm61_vm1 = vcmp.le.s32.totalorder %v34_v10, 14  ;;  %s1286_s16 = smov 126   ;;  %s1287_s17 = smov 112   ;;  %vm275_vm13 = vcmask 777216  }
   0x7   :  { %76 = vrot.lane.b32.xlu2 %v73_v11, %s1273_s28  ;;  %v1338_v15 = vsel %vm54_vm0, 1.0, %v1274_v14  ;;  %v1213_v16 = vsel %vm61_vm1, 1.0, %v1274_v14  ;;  %vm266_vm14 = vcmask 785408   ;;  %vm249_vm15 = vcmask 900096  }
   0x8   :  { %vm62_vm2 = vcmp.le.s32.totalorder %v41_v13, 14  ;;  %vm55_vm3 = vcmp.ge.s32.totalorder %v41_v13, 1  ;;  %vm206_vm0 = vcmask 1031168   ;;  %vm223_vm1 = vcmask 916480  }
   0x9   :  { %v1214_v17 = vsel %vm62_vm2, 1.0, %v1274_v14  ;;  %v1340_v18 = vsel %vm55_vm3, 1.0, %v1274_v14  ;;  %vm189_vm2 = vcmask 1039360   ;;  %vm329_vm3 = vcmask 588800  }
   0xa   :  { %v1242_v20 = vpack.i.bf16 %v1214_v17, %v1213_v16  ;;  %v1247_v21 = vpack.i.bf16 %v1340_v18, %v1338_v15 }
   0xe   :  { %386 = vrot.lane.b32.xlu0 %v383_v19, %s1273_s28  ;;  %1243 = vrot.lane.b32.xlu1 %v1242_v20, %s1275_s0 }
   0xf   :  { %1248 = vrot.lane.b32.xlu2 %v1247_v21, %s1276_s29 }
  0x16   :  { %1253 = vrot.lane.b32.xlu0 %v1242_v20, %s1277_s30  ;;  %1258 = vrot.lane.b32.xlu1 %v1242_v20, %s1278_s8 }
  0x17   :  { %1263 = vrot.lane.b32.xlu2 %v1247_v21, %s1279_s9 }
  0x61   :  { %v77_v29 = vpop.permute.xlu2 %76 }
  0x62   :  { %v1357_v30 = vsel %vm78_vm4, %v77_v29, 0 }
  0x63   :  { %v182_v50 = vrot.slane %v1357_v30, 4  ;;  %v1446_v12 = vunpack.c.l.bf16 %v1357_v30 }
  0x69   :  { %v1249_v42 = vpop.permute.xlu2 %1248 }
  0x6a   :  { %v1389_v45 = vunpack.i.h.bf16 %v1249_v42  ;;  %v1391_v46 = vunpack.i.l.bf16 %v1249_v42 }
  0x6c   :  { %v1415_v55 = vsel %vm149_vm6, %v1391_v46, %v1389_v45 }
  0x78   :  { %v385_v22 = vpop.permute.xlu0 %384  ;;  %v75_v24 = vpop.permute.xlu1 %74 }
  0x79   :  { %v391_v23 = vsel %vm78_vm4, 0, %v385_v22  ;;  %v1348_v26 = vsel %vm78_vm4, 0, %v75_v24  ;;  %v1360_v31 = vsel %vm78_vm4, %v75_v24, %v77_v29 }
  0x7a   :  { %477 = vrot.lane.b32.xlu0 %v391_v23, %s1280_s10  ;;  %v434_v32 = vrot.slane %v391_v23, 4  ;;  %v180_v39 = vrot.slane %v1348_v26, 4  ;;  %v1380_v41 = vunpack.c.l.bf16 %v391_v23  ;;  %v1394_v47 = vunpack.c.l.bf16 %v1348_v26 }
  0x7b   :  { %v1397_v48 = vunpack.c.l.bf16 %v1360_v31  ;;  %v181_v51 = vrot.slane %v1360_v31, 4 }
  0x7c   :  { %v398_v54 = vmul.f32 %v1338_v15, %v1380_v41  ;;  %v93_v57 = vmul.f32 %v1338_v15, %v1394_v47  ;;  %v417_v63 = vmul.f32 %v1391_v46, %v1380_v41 }
  0x7d   :  { %v94_v58 = vmul.f32 %v1340_v18, %v1397_v48 }
  0x7f   :  { %v1428_v62 = vpack.c.bf16 %v94_v58, %v93_v57 }
  0x80   :  { %v387_v25 = vpop.permute.xlu0 %386  ;;  %v1244_v33 = vpop.permute.xlu1 %1243 }
  0x81   :  { %v394_v27 = vsel %vm78_vm4, %v387_v25, 0  ;;  %v388_v28 = vsel %vm78_vm4, %v385_v22, %v387_v25  ;;  %v1367_v34 = vunpack.i.h.bf16 %v1244_v33  ;;  %v1369_v35 = vunpack.i.l.bf16 %v1244_v33 }
  0x82   :  { %481 = vrot.lane.b32.xlu2 %v394_v27, %s1280_s10  ;;  %479 = vrot.lane.b32.xlu1 %v388_v28, %s1280_s10  ;;  %v436_v36 = vrot.slane %v394_v27, 4  ;;  %v435_v37 = vrot.slane %v388_v28, 4  ;;  %v1371_v38 = vunpack.c.l.bf16 %v388_v28  ;;  %v1399_v49 = vunpack.c.l.bf16 %v394_v27 }
  0x83   :  { %226 = vrot.lane.b32.xlu0 %v1348_v26, %s1280_s10  ;;  %v1378_v40 = vsel %vm163_vm5, %v1369_v35, %v1367_v34  ;;  %v422_v43 = vmul.f32 %v1369_v35, %v1380_v41  ;;  %v168_v8 = vmul.f32 %v1369_v35, %v1394_v47  ;;  %v170_v23 = vmul.f32 %v1367_v34, %v1446_v12 }
  0x84   :  { %v423_v44 = vmul.f32 %v1371_v38, %v1378_v40  ;;  %v399_v52 = vmul.f32 %v1340_v18, %v1371_v38  ;;  %v424_v59 = vmul.f32 %v1367_v34, %v1399_v49  ;;  %v418_v61 = vmul.f32 %v1371_v38, %v1415_v55 }
  0x85   :  { %v419_v6 = vmul.f32 %v1389_v45, %v1399_v49  ;;  %v169_v9 = vmul.f32 %v1378_v40, %v1397_v48 }
  0x86   :  { %v425_v53 = vpack.c.bf16 %v423_v44, %v422_v43  ;;  %v1418_v56 = vpack.c.bf16 %v399_v52, %v398_v54  ;;  %v426_v0 = vpack.c.bf16 %v424_v59, %v424_v59  ;;  %v420_v2 = vpack.c.bf16 %v418_v61, %v417_v63 }
  0x87   :  { %v421_v16 = vpack.c.bf16 %v419_v6, %v419_v6  ;;  %v171_v19 = vpack.c.bf16 %v169_v9, %v168_v8  ;;  %v155_v54 = vmul.f32 %v1415_v55, %v1397_v48 }
  0x88   :  { %v527_v60 = vunpack.c.l.b16 %v425_v53  ;;  %v1254_v3 = vpop.permute.xlu0 %1253  ;;  %v529_v4 = vunpack.c.l.b16 %v426_v0  ;;  %v528_v5 = vunpack.c.h.b16 %v425_v53  ;;  %v503_v7 = vunpack.c.l.b16 %v420_v2 }
  0x89   :  { %v1441_v10 = vunpack.i.h.bf16 %v1254_v3  ;;  %v1443_v11 = vunpack.i.l.bf16 %v1254_v3  ;;  %v505_v21 = vunpack.c.l.b16 %v421_v16  ;;  %v504_v22 = vunpack.c.h.b16 %v420_v2 }
  0x8a   :  { %230 = vrot.lane.b32.xlu2 %v1357_v30, %s1280_s10  ;;  %228 = vrot.lane.b32.xlu1 %v1360_v31, %s1280_s10  ;;  %v530_v1 = vpack.c.b16 %v527_v60, %v527_v60  ;;  %v532_v13 = vpack.c.b16 %v529_v4, %v529_v4  ;;  %v531_v14 = vpack.c.b16 %v528_v5, %v528_v5  ;;  %v280_v24 = vunpack.c.l.b16 %v171_v19  ;;  %v1264_v5 = vpop.permute.xlu2 %1263 }
  0x8b   :  { %517 = vrot.lane.b32.xlu0 %v434_v32, %s1281_s11  ;;  %v506_v17 = vpack.c.b16 %v503_v7, %v503_v7  ;;  %v1452_v20 = vsel %vm135_vm7, %v1443_v11, %v1441_v10  ;;  %v412_v25 = vmul.f32 %v1443_v11, %v1380_v41  ;;  %v508_v28 = vpack.c.b16 %v505_v21, %v505_v21 }
  0x8c   :  { %v413_v27 = vmul.f32 %v1371_v38, %v1452_v20  ;;  %v507_v29 = vpack.c.b16 %v504_v22, %v504_v22  ;;  %v283_v33 = vpack.c.b16 %v280_v24, %v280_v24  ;;  %v281_v43 = vunpack.c.h.b16 %v171_v19 }
  0x8d   :  { %v414_v44 = vmul.f32 %v1441_v10, %v1399_v49  ;;  %v154_v53 = vmul.f32 %v1391_v46, %v1394_v47  ;;  %v156_v4 = vmul.f32 %v1389_v45, %v1446_v12  ;;  %v1487_v9 = vunpack.i.h.bf16 %v1264_v5 }
  0x8e   :  { %v284_v60 = vpack.c.b16 %v281_v43, %v281_v43 }
  0x8f   :  { %v416_v61 = vpack.c.bf16 %v414_v44, %v414_v44  ;;  %v157_v0 = vpack.c.bf16 %v155_v54, %v154_v53  ;;  %v141_v53 = vmul.f32 %v1452_v20, %v1397_v48 }
  0x91   :  { %v489_v2 = vunpack.c.l.b16 %v416_v61  ;;  %v254_v6 = vunpack.c.l.b16 %v157_v0  ;;  %v255_v24 = vunpack.c.h.b16 %v157_v0 }
  0x92   :  { %521 = vrot.lane.b32.xlu2 %v436_v36, %s1281_s11  ;;  %519 = vrot.lane.b32.xlu1 %v435_v37, %s1281_s11 }
  0x93   :  { %269 = vrot.lane.b32.xlu0 %v180_v39, %s1281_s11  ;;  %v257_v19 = vpack.c.b16 %v254_v6, %v254_v6 }
  0x9a   :  { %273 = vrot.lane.b32.xlu2 %v182_v50, %s1281_s11  ;;  %271 = vrot.lane.b32.xlu1 %v181_v51, %s1281_s11 }
  0x9b   :  { %437 = vrot.lane.b32.xlu0 %v434_v32, %s1282_s12  ;;  %v172_v32 = vpack.c.bf16 %v170_v23, %v170_v23 }
  0x9d   :  { %v282_v42 = vunpack.c.l.b16 %v172_v32 }
  0x9f   :  { %v285_v59 = vpack.c.b16 %v282_v42, %v282_v42 }
  0xa2   :  { %441 = vrot.lane.b32.xlu2 %v436_v36, %s1282_s12  ;;  %439 = vrot.lane.b32.xlu1 %v435_v37, %s1282_s12  ;;  %v415_v36 = vpack.c.bf16 %v413_v27, %v412_v25  ;;  %v1259_v37 = vpop.permute.xlu1 %1258 }
  0xa3   :  { %533 = vrot.lane.b32.xlu0 %v530_v1, %s1283_s13  ;;  %v1470_v57 = vunpack.i.h.bf16 %v1259_v37  ;;  %v1472_v58 = vunpack.i.l.bf16 %v1259_v37 }
  0xa4   :  { %v487_v52 = vunpack.c.l.b16 %v415_v36  ;;  %v488_v3 = vunpack.c.h.b16 %v415_v36 }
  0xa5   :  { %v1478_v1 = vsel %vm105_vm8, %v1472_v58, %v1470_v57  ;;  %v402_v7 = vmul.f32 %v1472_v58, %v1380_v41  ;;  %v404_v25 = vmul.f32 %v1470_v57, %v1399_v49 }
  0xa6   :  { %v490_v63 = vpack.c.b16 %v487_v52, %v487_v52  ;;  %v403_v8 = vmul.f32 %v1371_v38, %v1478_v1  ;;  %v491_v16 = vpack.c.b16 %v488_v3, %v488_v3 }
  0xa7   :  { %v406_v36 = vpack.c.bf16 %v404_v25, %v404_v25 }
  0xa8   :  { %v405_v21 = vpack.c.bf16 %v403_v8, %v402_v7 }
  0xa9   :  { %v449_v43 = vunpack.c.l.b16 %v406_v36 }
  0xaa   :  { %537 = vrot.lane.b32.xlu2 %v532_v13, %s1283_s13  ;;  %535 = vrot.lane.b32.xlu1 %v531_v14, %s1283_s13  ;;  %v1489_v13 = vunpack.i.l.bf16 %v1264_v5  ;;  %v492_v14 = vpack.c.b16 %v489_v2, %v489_v2  ;;  %v447_v27 = vunpack.c.l.b16 %v405_v21  ;;  %v448_v44 = vunpack.c.h.b16 %v405_v21 }
  0xab   :  { %509 = vrot.lane.b32.xlu0 %v506_v17, %s1284_s14  ;;  %v158_v17 = vpack.c.bf16 %v156_v4, %v156_v4  ;;  %v452_v54 = vpack.c.b16 %v449_v43, %v449_v43  ;;  %v142_v2 = vmul.f32 %v1441_v10, %v1446_v12  ;;  %v110_v4 = vmul.f32 %v1472_v58, %v1394_v47 }
  0xac   :  { %v1495_v22 = vsel %vm121_vm9, %v1489_v13, %v1487_v9  ;;  %v450_v37 = vpack.c.b16 %v447_v27, %v447_v27  ;;  %v111_v5 = vmul.f32 %v1478_v1, %v1397_v48  ;;  %v126_v25 = vmul.f32 %v1489_v13, %v1394_v47 }
  0xad   :  { %v256_v23 = vunpack.c.l.b16 %v158_v17  ;;  %v144_v8 = vpack.c.bf16 %v142_v2, %v142_v2  ;;  %v127_v27 = vmul.f32 %v1495_v22, %v1397_v48 }
  0xaf   :  { %v259_v32 = vpack.c.b16 %v256_v23, %v256_v23  ;;  %v112_v23 = vmul.f32 %v1470_v57, %v1446_v12  ;;  %v129_v36 = vpack.c.bf16 %v127_v27, %v126_v25 }
  0xb2   :  { %513 = vrot.lane.b32.xlu2 %v508_v28, %s1284_s14  ;;  %511 = vrot.lane.b32.xlu1 %v507_v29, %s1284_s14  ;;  %v408_v28 = vmul.f32 %v1371_v38, %v1495_v22  ;;  %v407_v29 = vmul.f32 %v1489_v13, %v1380_v41  ;;  %v409_v38 = vmul.f32 %v1487_v9, %v1399_v49 }
  0xb3   :  { %286 = vrot.lane.b32.xlu0 %v283_v33, %s1283_s13  ;;  %v258_v33 = vpack.c.b16 %v255_v24, %v255_v24  ;;  %v140_v41 = vmul.f32 %v1443_v11, %v1394_v47  ;;  %v128_v47 = vmul.f32 %v1487_v9, %v1446_v12 }
  0xb4   :  { %v410_v42 = vpack.c.bf16 %v408_v28, %v407_v29 }
  0xb6   :  { %v463_v52 = vunpack.c.l.b16 %v410_v42  ;;  %v464_v0 = vunpack.c.h.b16 %v410_v42 }
  0xb8   :  { %v466_v61 = vpack.c.b16 %v463_v52, %v463_v52  ;;  %v467_v7 = vpack.c.b16 %v464_v0, %v464_v0  ;;  %v130_v52 = vpack.c.bf16 %v128_v47, %v128_v47 }
  0xba   :  { %290 = vrot.lane.b32.xlu2 %v285_v59, %s1283_s13  ;;  %288 = vrot.lane.b32.xlu1 %v284_v60, %s1283_s13  ;;  %v451_v59 = vpack.c.b16 %v448_v44, %v448_v44  ;;  %v411_v60 = vpack.c.bf16 %v409_v38, %v409_v38  ;;  %v211_v44 = vunpack.c.l.b16 %v129_v36 }
  0xbb   :  { %493 = vrot.lane.b32.xlu0 %v490_v63, %s1285_s15  ;;  %v143_v63 = vpack.c.bf16 %v141_v53, %v140_v41 }
  0xbc   :  { %v465_v49 = vunpack.c.l.b16 %v411_v60  ;;  %v214_v41 = vpack.c.b16 %v211_v44, %v211_v44  ;;  %v212_v60 = vunpack.c.h.b16 %v129_v36 }
  0xbd   :  { %v237_v3 = vunpack.c.l.b16 %v143_v63  ;;  %v238_v21 = vunpack.c.h.b16 %v143_v63 }
  0xbe   :  { %v468_v6 = vpack.c.b16 %v465_v49, %v465_v49  ;;  %v215_v63 = vpack.c.b16 %v212_v60, %v212_v60 }
  0xbf   :  { %v241_v29 = vpack.c.b16 %v238_v21, %v238_v21 }
  0xc2   :  { %497 = vrot.lane.b32.xlu2 %v492_v14, %s1285_s15  ;;  %495 = vrot.lane.b32.xlu1 %v491_v16, %s1285_s15  ;;  %v240_v14 = vpack.c.b16 %v237_v3, %v237_v3  ;;  %v113_v16 = vpack.c.bf16 %v111_v5, %v110_v4 }
  0xc3   :  { %260 = vrot.lane.b32.xlu0 %v257_v19, %s1284_s14  ;;  %v239_v19 = vunpack.c.l.b16 %v144_v8 }
  0xc4   :  { %v194_v24 = vunpack.c.l.b16 %v113_v16  ;;  %v195_v43 = vunpack.c.h.b16 %v113_v16 }
  0xc5   :  { %v242_v28 = vpack.c.b16 %v239_v19, %v239_v19 }
  0xc6   :  { %v198_v48 = vpack.c.b16 %v195_v43, %v195_v43 }
  0xca   :  { %264 = vrot.lane.b32.xlu2 %v259_v32, %s1284_s14  ;;  %262 = vrot.lane.b32.xlu1 %v258_v33, %s1284_s14  ;;  %v114_v32 = vpack.c.bf16 %v112_v23, %v112_v23  ;;  %v197_v33 = vpack.c.b16 %v194_v24, %v194_v24 }
  0xcb   :  { %453 = vrot.lane.b32.xlu0 %v450_v37, %s1286_s16 }
  0xcc   :  { %v196_v42 = vunpack.c.l.b16 %v114_v32 }
  0xce   :  { %v199_v38 = vpack.c.b16 %v196_v42, %v196_v42 }
  0xd2   :  { %457 = vrot.lane.b32.xlu2 %v452_v54, %s1286_s16  ;;  %455 = vrot.lane.b32.xlu1 %v451_v59, %s1286_s16  ;;  %v213_v59 = vunpack.c.l.b16 %v130_v52 }
  0xd3   :  { %469 = vrot.lane.b32.xlu0 %v466_v61, %s1287_s17 }
  0xd4   :  { %v216_v61 = vpack.c.b16 %v213_v59, %v213_v59 }
  0xda   :  { %473 = vrot.lane.b32.xlu2 %v468_v6, %s1287_s17  ;;  %471 = vrot.lane.b32.xlu1 %v467_v7, %s1287_s17 }
  0xdb   :  { %243 = vrot.lane.b32.xlu0 %v240_v14, %s1285_s15 }
  0xdc   :  { %v482_v17 = vpop.permute.xlu2 %481 }
  0xe2   :  { %247 = vrot.lane.b32.xlu2 %v242_v28, %s1285_s15  ;;  %245 = vrot.lane.b32.xlu1 %v241_v29, %s1285_s15 }
  0xe3   :  { %200 = vrot.lane.b32.xlu0 %v197_v33, %s1286_s16 }
  0xe4   :  { %v231_v37 = vpop.permute.xlu2 %230 }
  0xea   :  { %204 = vrot.lane.b32.xlu2 %v199_v38, %s1286_s16  ;;  %202 = vrot.lane.b32.xlu1 %v198_v48, %s1286_s16 }
  0xeb   :  { %217 = vrot.lane.b32.xlu0 %v214_v41, %s1287_s17 }
  0xec   :  { %v478_v53 = vpop.permute.xlu0 %477  ;;  %v522_v54 = vpop.permute.xlu2 %521 }
  0xf2   :  { %221 = vrot.lane.b32.xlu2 %v216_v61, %s1287_s17  ;;  %219 = vrot.lane.b32.xlu1 %v215_v63, %s1287_s17 }
  0xf3   :  { %183 = vrot.lane.b32.xlu0 %v180_v39, %s1282_s12 }
  0xf4   :  { %v1544_v12 = vpop.permute.xlu2 %273  ;;  %v480_v49 = vpop.permute.xlu1 %479 }
  0xf5   :  { %v227_v0 = vpop.permute.xlu0 %226  ;;  %v483_v2 = vsel %vm232_vm10, %v478_v53, %v480_v49  ;;  %v484_v3 = vsel %vm232_vm10, %v480_v49, %v482_v17 }
  0xfa   :  { %187 = vrot.lane.b32.xlu2 %v182_v50, %s1282_s12  ;;  %185 = vrot.lane.b32.xlu1 %v181_v51, %s1282_s12 }
  0xfc   :  { %v229_v4 = vpop.permute.xlu1 %228  ;;  %v1554_v5 = vpop.permute.xlu2 %441 }
  0xfd   :  { %v518_v26 = vpop.permute.xlu0 %517  ;;  %v1557_v39 = vsel %vm232_vm10, %v227_v0, %v229_v4  ;;  %v1560_v6 = vsel %vm232_vm10, %v229_v4, %v231_v37 }
 0x104   :  { %v520_v7 = vpop.permute.xlu1 %519  ;;  %v538_v14 = vpop.permute.xlu2 %537 }
 0x105   :  { %v270_v8 = vpop.permute.xlu0 %269  ;;  %v523_v29 = vsel %vm275_vm13, %v518_v26, %v520_v7  ;;  %v524_v32 = vsel %vm275_vm13, %v520_v7, %v522_v54 }
 0x10c   :  { %v272_v16 = vpop.permute.xlu1 %271  ;;  %v514_v50 = vpop.permute.xlu2 %513 }
 0x10d   :  { %v1562_v30 = vpop.permute.xlu0 %437  ;;  %v276_v7 = vsel %vm275_vm13, %v270_v8, %v272_v16 }
 0x114   :  { %v1564_v17 = vpop.permute.xlu1 %439  ;;  %v291_v51 = vpop.permute.xlu2 %290 }
 0x115   :  { %v534_v31 = vpop.permute.xlu0 %533 }
 0x11c   :  { %v536_v19 = vpop.permute.xlu1 %535  ;;  %v498_v33 = vpop.permute.xlu2 %497 }
 0x11d   :  { %v510_v21 = vpop.permute.xlu0 %509  ;;  %v539_v23 = vsel %vm292_vm11, %v534_v31, %v536_v19  ;;  %v540_v24 = vsel %vm292_vm11, %v536_v19, %v538_v14  ;;  %v277_v14 = vsel %vm275_vm13, %v272_v16, %v1544_v12  ;;  %v428_v12 = vunpack.c.l.b16 %v1418_v56 }
 0x11e   :  { %v578_v25 = vsel %vm295_vm12, %v539_v23, 0  ;;  %v581_v27 = vsel %vm295_vm12, %v540_v24, 0  ;;  %v429_v16 = vunpack.c.h.b16 %v1418_v56  ;;  %v444_v56 = vsel %vm189_vm2, %v1564_v17, %v1554_v5 }
 0x11f   :  { %586 = vmatpush.bf16.msra.mxu2 %v578_v25  ;;  %599 = vmatpush.bf16.msra.mxu3 %v581_v27 }
 0x124   :  { %v512_v28 = vpop.permute.xlu1 %511  ;;  %v265_v54 = vpop.permute.xlu2 %264 }
 0x125   :  { %v515_v36 = vsel %vm266_vm14, %v510_v21, %v512_v28  ;;  %v516_v37 = vsel %vm266_vm14, %v512_v28, %v514_v50  ;;  %v287_v42 = vpop.permute.xlu0 %286 }
 0x126   :  { %v567_v43 = vsel %vm295_vm12, %v515_v36, %v523_v29  ;;  %v571_v47 = vsel %vm295_vm12, %v516_v37, %v524_v32  ;;  %v443_v37 = vsel %vm189_vm2, %v1562_v30, %v1564_v17 }
 0x127   :  { %587 = vmatpush.bf16.msra.mxu2 %v567_v43  ;;  %600 = vmatpush.bf16.msra.mxu3 %v571_v47  ;;  %v431_v43 = vpack.c.b16 %v429_v16, %v429_v16 }
 0x12c   :  { %v289_v44 = vpop.permute.xlu1 %288  ;;  %v458_v4 = vpop.permute.xlu2 %457 }
 0x12d   :  { %v494_v38 = vpop.permute.xlu0 %493  ;;  %v293_v48 = vsel %vm292_vm11, %v287_v42, %v289_v44  ;;  %v294_v52 = vsel %vm292_vm11, %v289_v44, %v291_v51  ;;  %v430_v42 = vpack.c.b16 %v428_v12, %v428_v12  ;;  %v547_v44 = vsel %vm295_vm12, %v431_v43, %v444_v56 }
 0x12e   :  { %v334_v41 = vsel %vm295_vm12, %v293_v48, 0  ;;  %v337_v53 = vsel %vm295_vm12, %v294_v52, 0 }
 0x12f   :  { %342 = vmatpush.bf16.msra.mxu0 %v334_v41  ;;  %355 = vmatpush.bf16.msra.mxu1 %v337_v53  ;;  %v543_v47 = vsel %vm295_vm12, %v430_v42, %v443_v37 }
 0x134   :  { %v496_v59 = vpop.permute.xlu1 %495 }
 0x135   :  { %v499_v60 = vsel %vm249_vm15, %v494_v38, %v496_v59  ;;  %v500_v61 = vsel %vm249_vm15, %v496_v59, %v498_v33  ;;  %v261_v63 = vpop.permute.xlu0 %260  ;;  %v573_v38 = vld [vmem:[%s1911_s1] sm:$0xf] }
 0x136   :  { %v559_v49 = vsel %vm295_vm12, %v483_v2, %v499_v60  ;;  %v563_v0 = vsel %vm295_vm12, %v484_v3, %v500_v61  ;;  %v474_v3 = vpop.permute.xlu2 %473 }
 0x137   :  { %588 = vmatpush.bf16.msra.mxu2 %v559_v49  ;;  %601 = vmatpush.bf16.msra.mxu3 %v563_v0 }
 0x13c   :  { %v263_v26 = vpop.permute.xlu1 %262 }
 0x13d   :  { %v267_v50 = vsel %vm266_vm14, %v261_v63, %v263_v26  ;;  %v268_v31 = vsel %vm266_vm14, %v263_v26, %v265_v54  ;;  %v454_v51 = vpop.permute.xlu0 %453  ;;  %v174_v26 = vunpack.c.l.b16 %v1428_v62 }
 0x13e   :  { %v322_v19 = vsel %vm295_vm12, %v267_v50, %v276_v7  ;;  %v326_v2 = vsel %vm295_vm12, %v268_v31, %v277_v14  ;;  %v248_v24 = vpop.permute.xlu2 %247  ;;  %v175_v7 = vunpack.c.h.b16 %v1428_v62 }
 0x13f   :  { %343 = vmatpush.bf16.msra.mxu0 %v322_v19  ;;  %356 = vmatpush.bf16.msra.mxu1 %v326_v2 }
 0x140   :  { %v177_v19 = vpack.c.b16 %v175_v7, %v175_v7 }
 0x144   :  { %v456_v21 = vpop.permute.xlu1 %455 }
 0x145   :  { %v470_v23 = vpop.permute.xlu0 %469  ;;  %v459_v25 = vsel %vm206_vm0, %v454_v51, %v456_v21  ;;  %v460_v27 = vsel %vm206_vm0, %v456_v21, %v458_v4  ;;  %v176_v51 = vpack.c.b16 %v174_v26, %v174_v26 }
 0x146   :  { %v205_v41 = vpop.permute.xlu2 %204 }
 0x14c   :  { %v472_v8 = vpop.permute.xlu1 %471 }
 0x14d   :  { %v475_v28 = vsel %vm223_vm1, %v470_v23, %v472_v8  ;;  %v476_v29 = vsel %vm223_vm1, %v472_v8, %v474_v3  ;;  %v244_v32 = vpop.permute.xlu0 %243  ;;  %v328_v8 = vld [vmem:[%s1911_s1] sm:$0xf] }
 0x14e   :  { %v551_v33 = vsel %vm295_vm12, %v459_v25, %v475_v28  ;;  %v555_v36 = vsel %vm295_vm12, %v460_v27, %v476_v29  ;;  %v222_v59 = vpop.permute.xlu2 %221 }
 0x14f   :  { %589 = vmatpush.bf16.msra.mxu2 %v551_v33  ;;  %602 = vmatpush.bf16.msra.mxu3 %v555_v36 }
 0x153   :  { %590 = vmatpush.bf16.msra.mxu2 %v543_v47  ;;  %603 = vmatpush.bf16.msra.mxu3 %v547_v44 }
 0x154   :  { %v246_v30 = vpop.permute.xlu1 %245 }
 0x155   :  { %v250_v48 = vsel %vm249_vm15, %v244_v32, %v246_v30  ;;  %v251_v5 = vsel %vm249_vm15, %v246_v30, %v248_v24  ;;  %v201_v53 = vpop.permute.xlu0 %200 }
 0x156   :  { %v314_v17 = vsel %vm295_vm12, %v1557_v39, %v250_v48  ;;  %v318_v52 = vsel %vm295_vm12, %v1560_v6, %v251_v5  ;;  %1219 = vmatmul.msk.bf16.vlgmr.msra.gmra.mxu3 %vm329_vm3, %v573_v38  ;;  %1218 = vmatmul.msk.bf16.vlgmr.msra.gmra.mxu2 %vm329_vm3, %v573_v38  ;;  %v188_v14 = vpop.permute.xlu2 %187  ;;  %v1288_v38 = vmov 0  }
 0x157   :  { %344 = vmatpush.bf16.msra.mxu0 %v314_v17  ;;  %357 = vmatpush.bf16.msra.mxu1 %v318_v52 }
 0x158   :  { %1267 = vset.pattern.permute.xlu0 %v1288_v38  ;;  %1268 = vset.pattern.permute.xlu1 %v1288_v38 }
 0x15c   :  { %v203_v54 = vpop.permute.xlu1 %202 }
 0x15d   :  { %v218_v60 = vpop.permute.xlu0 %217  ;;  %v207_v63 = vsel %vm206_vm0, %v201_v53, %v203_v54  ;;  %v208_v49 = vsel %vm206_vm0, %v203_v54, %v205_v41 }
 0x164   :  { %v220_v61 = vpop.permute.xlu1 %219 }
 0x165   :  { %v224_v39 = vsel %vm223_vm1, %v218_v60, %v220_v61  ;;  %v225_v6 = vsel %vm223_vm1, %v220_v61, %v222_v59  ;;  %v184_v50 = vpop.permute.xlu0 %183 }
 0x166   :  { %v306_v0 = vsel %vm295_vm12, %v207_v63, %v224_v39  ;;  %v310_v4 = vsel %vm295_vm12, %v208_v49, %v225_v6 }
 0x167   :  { %345 = vmatpush.bf16.msra.mxu0 %v306_v0  ;;  %358 = vmatpush.bf16.msra.mxu1 %v310_v4  ;;  %v622_v4 = vld [vmem:[%s1912_s2] sm:$0xff] }
 0x16c   :  { %v186_v31 = vpop.permute.xlu1 %185 }
 0x16d   :  { %v190_v2 = vsel %vm189_vm2, %v184_v50, %v186_v31  ;;  %v191_v3 = vsel %vm189_vm2, %v186_v31, %v188_v14  ;;  %v623_v50 = vld [vmem:[%s1913_s3] sm:$0xff] }
 0x16e   :  { %v298_v21 = vsel %vm295_vm12, %v176_v51, %v190_v2  ;;  %v302_v23 = vsel %vm295_vm12, %v177_v19, %v191_v3 }
 0x16f   :  { %346 = vmatpush.bf16.msra.mxu0 %v298_v21  ;;  %359 = vmatpush.bf16.msra.mxu1 %v302_v23 }
 0x172   :  { %1215 = vmatmul.msk.bf16.vlgmr.msra.gmra.mxu0 %vm329_vm3, %v328_v8  ;;  %1216 = vmatmul.msk.bf16.vlgmr.msra.gmra.mxu1 %vm329_vm3, %v328_v8 }
 0x1d9   :  { %v592_v62 = vpop.f32.mrf.mxu2  ;;  %v605_v12 = vpop.f32.mrf.mxu3 }
 0x1da   :  { %v612_v16 = vadd.f32 %v605_v12, %v592_v62  ;;  %v616_v37 = vmul.f32 %v592_v62, %v592_v62  ;;  %v617_v56 = vmul.f32 %v605_v12, %v605_v12 }
 0x1dc   :  { %613 = vadd.xlane.f32.xlu1 %v612_v16  ;;  %v618_v47 = vadd.f32 %v617_v56, %v616_v37 }
 0x1e1   :  { %v594_v24 = vpop.f32.mrf.mxu2  ;;  %v607_v25 = vpop.f32.mrf.mxu3 }
 0x1ef   :  { %v348_v27 = vpop.f32.mrf.mxu0  ;;  %v361_v28 = vpop.f32.mrf.mxu1 }
 0x1f0   :  { %v367_v29 = vadd.f32 %v361_v28, %v348_v27  ;;  %v371_v32 = vmul.f32 %v348_v27, %v348_v27  ;;  %v372_v33 = vmul.f32 %v361_v28, %v361_v28 }
 0x1f2   :  { %368 = vadd.xlane.f32.xlu0 %v367_v29  ;;  %v373_v36 = vadd.f32 %v372_v33, %v371_v32 }
 0x1f4   :  { %374 = vadd.xlane.f32.xlu2 %v373_v36 }
 0x1f7   :  { %v350_v42 = vpop.f32.mrf.mxu0  ;;  %v363_v43 = vpop.f32.mrf.mxu1 }
 0x1fc   :  { %619 = vadd.xlane.f32.xlu2 %v618_v47 }
 0x24f   :  { %v614_v44 = vpop.xlane.xlu1 %613 }
 0x265   :  { %v369_v30 = vpop.xlane.xlu0 %368 }
 0x266   :  { %v615_v5 = vadd.f32 %v614_v44, %v369_v30 }
 0x267   :  { %v375_v48 = vpop.xlane.xlu2 %374 }
 0x268   :  { %v624_v17 = vmul.f32 0.001953125, %v615_v5 }
 0x26a   :  { %v626_v53 = vmul.f32 %v624_v17, %v624_v17 }
 0x26f   :  { %v620_v52 = vpop.xlane.xlu2 %619 }
 0x270   :  { %v621_v41 = vadd.f32 %v620_v52, %v375_v48 }
 0x272   :  { %v625_v54 = vmul.f32 0.001953125, %v621_v41 }
 0x274   :  { %v627_v59 = vsub.f32 %v625_v54, %v626_v53 }
 0x276   :  { %v628_v60 = vmax.f32 %v627_v59, 0.0 }
 0x278   :  { %v629_v61 = vadd.f32 1e-05, %v628_v60 }
 0x27a   :  { %1269 = vrsqrt.f32 %v629_v61  ;;  %vm636_vm6 = vweird.f32 %v629_v61 }
 0x280   :  { %v1270_v63 = vpop.eup %1269 }
 0x281   :  { %v631_v49 = vmul.f32 %v1270_v63, %v629_v61  ;;  %vm637_vm5 = vweird.f32 %v1270_v63 }
 0x282   :  { %vm638_vm7 = vmor %vm636_vm6, %vm637_vm5 }
 0x283   :  { %v632_v39 = vmul.f32 %v1270_v63, %v631_v49 }
 0x285   :  { %v633_v6 = vmul.f32 0.5, %v632_v39 }
 0x287   :  { %v634_v0 = vsub.f32 1.5, %v633_v6 }
 0x289   :  { %v635_v26 = vmul.f32 %v1270_v63, %v634_v0 }
 0x28b   :  { %v639_v7 = vsel %vm638_vm7, %v1270_v63, %v635_v26 }
 0x28c   :  { %v640_v14 = vmul.f32 %v639_v7, %v622_v4 }
 0x28e   :  { %647 = vperm.xlu0 %1267, %v640_v14   ;;  %v641_v31 = vmul.f32 %v640_v14, %v624_v17 }
 0x290   :  { %v642_v51 = vsub.f32 %v623_v50, %v641_v31 }
 0x292   :  { %654 = vperm.xlu1 %1268, %v642_v51  }
 0x300   :  { %v648_v19 = vpop.permute.xlu0 %647 }
 0x301   :  { %v650_v2 = vmul.f32 %v648_v19, %v348_v27  ;;  %v651_v3 = vmul.f32 %v648_v19, %v361_v28  ;;  %v906_v21 = vmul.f32 %v648_v19, %v592_v62  ;;  %v907_v23 = vmul.f32 %v648_v19, %v605_v12 }
 0x304   :  { %v655_v8 = vpop.permute.xlu1 %654 }
 0x305   :  { %v657_v16 = vadd.f32 %v655_v8, %v650_v2  ;;  %v658_v24 = vadd.f32 %v655_v8, %v651_v3  ;;  %v908_v25 = vadd.f32 %v906_v21, %v655_v8  ;;  %v909_v29 = vadd.f32 %v907_v23, %v655_v8 }
 0x307   :  { %v910_v32 = vmax.f32 %v908_v25, 0.0  ;;  %v911_v33 = vmax.f32 %v909_v29, 0.0  ;;  %v659_v36 = vmax.f32 %v657_v16, 0.0  ;;  %v660_v37 = vmax.f32 %v658_v24, 0.0 }
 0x309   :  { %v912_v56 = vpack.c.bf16 %v911_v33, %v910_v32  ;;  %v661_v38 = vpack.c.bf16 %v660_v37, %v659_v36 }
 0x30b   :  { %v915_v42 = vunpack.c.h.b16 %v912_v56  ;;  %v914_v43 = vunpack.c.l.b16 %v912_v56  ;;  %v664_v62 = vunpack.c.h.b16 %v661_v38  ;;  %v663_v12 = vunpack.c.l.b16 %v661_v38 }
 0x30d   :  { %v917_v47 = vpack.c.b16 %v915_v42, %v915_v42  ;;  %v916_v44 = vpack.c.b16 %v914_v43, %v914_v43  ;;  %v666_v27 = vpack.c.b16 %v664_v62, %v664_v62  ;;  %v665_v28 = vpack.c.b16 %v663_v12, %v663_v12 }
 0x30f   :  { %920 = vrot.lane.b32.xlu1 %v917_v47, %s1273_s28  ;;  %918 = vrot.lane.b32.xlu2 %v916_v44, %s1273_s28 }
 0x317   :  { %669 = vrot.lane.b32.xlu1 %v666_v27, %s1273_s28  ;;  %667 = vrot.lane.b32.xlu2 %v665_v28, %s1273_s28 }
 0x369   :  { %v919_v30 = vpop.permute.xlu2 %918 }
 0x36a   :  { %v925_v48 = vsel %vm78_vm4, 0, %v919_v30 }
 0x36b   :  { %1011 = vrot.lane.b32.xlu2 %v925_v48, %s1280_s10  ;;  %v968_v52 = vrot.slane %v925_v48, 4  ;;  %v1660_v61 = vunpack.c.l.bf16 %v925_v48 }
 0x36d   :  { %v956_v49 = vmul.f32 %v1369_v35, %v1660_v61  ;;  %v951_v14 = vmul.f32 %v1391_v46, %v1660_v61  ;;  %v946_v43 = vmul.f32 %v1443_v11, %v1660_v61 }
 0x371   :  { %v668_v5 = vpop.permute.xlu2 %667 }
 0x372   :  { %v1648_v17 = vsel %vm78_vm4, 0, %v668_v5 }
 0x373   :  { %760 = vrot.lane.b32.xlu2 %v1648_v17, %s1280_s10  ;;  %v717_v59 = vrot.slane %v1648_v17, 4  ;;  %v1690_v3 = vunpack.c.l.bf16 %v1648_v17 }
 0x375   :  { %v705_v8 = vmul.f32 %v1369_v35, %v1690_v3  ;;  %v681_v33 = vmul.f32 %v1338_v15, %v1690_v3  ;;  %v700_v48 = vmul.f32 %v1391_v46, %v1690_v3 }
 0x37b   :  { %1051 = vrot.lane.b32.xlu2 %v968_v52, %s1281_s11 }
 0x381   :  { %v921_v41 = vpop.permute.xlu1 %920 }
 0x382   :  { %v928_v53 = vsel %vm78_vm4, %v921_v41, 0  ;;  %v922_v54 = vsel %vm78_vm4, %v919_v30, %v921_v41 }
 0x383   :  { %1015 = vrot.lane.b32.xlu1 %v928_v53, %s1280_s10  ;;  %1013 = vrot.lane.b32.xlu0 %v922_v54, %s1280_s10  ;;  %v1658_v60 = vunpack.c.l.bf16 %v922_v54  ;;  %v970_v50 = vrot.slane %v928_v53, 4  ;;  %v969_v31 = vrot.slane %v922_v54, 4  ;;  %v1697_v16 = vunpack.c.l.bf16 %v928_v53 }
 0x384   :  { %800 = vrot.lane.b32.xlu2 %v717_v59, %s1281_s11 }
 0x385   :  { %v957_v63 = vmul.f32 %v1658_v60, %v1378_v40  ;;  %v952_v7 = vmul.f32 %v1658_v60, %v1415_v55  ;;  %v958_v35 = vmul.f32 %v1367_v34, %v1697_v16  ;;  %v947_v37 = vmul.f32 %v1658_v60, %v1452_v20 }
 0x386   :  { %v933_v56 = vmul.f32 %v1340_v18, %v1658_v60 }
 0x387   :  { %v959_v4 = vpack.c.bf16 %v957_v63, %v956_v49  ;;  %v954_v2 = vpack.c.bf16 %v952_v7, %v951_v14  ;;  %v960_v38 = vpack.c.bf16 %v958_v35, %v958_v35 }
 0x389   :  { %v670_v39 = vpop.permute.xlu1 %669  ;;  %v1061_v26 = vunpack.c.l.b16 %v959_v4  ;;  %v1037_v21 = vunpack.c.l.b16 %v954_v2  ;;  %v1063_v12 = vunpack.c.l.b16 %v960_v38  ;;  %v1062_v27 = vunpack.c.h.b16 %v959_v4 }
 0x38a   :  { %v1670_v6 = vsel %vm78_vm4, %v670_v39, 0  ;;  %v1673_v0 = vsel %vm78_vm4, %v668_v5, %v670_v39  ;;  %v1038_v39 = vunpack.c.h.b16 %v954_v2  ;;  %v937_v4 = vmul.f32 %v1658_v60, %v1478_v1 }
 0x38b   :  { %764 = vrot.lane.b32.xlu1 %v1670_v6, %s1280_s10  ;;  %762 = vrot.lane.b32.xlu0 %v1673_v0, %s1280_s10  ;;  %v1685_v51 = vunpack.c.l.bf16 %v1673_v0  ;;  %v1064_v19 = vpack.c.b16 %v1061_v26, %v1061_v26  ;;  %v719_v24 = vrot.slane %v1670_v6, 4  ;;  %v718_v25 = vrot.slane %v1673_v0, 4 }
 0x38c   :  { %971 = vrot.lane.b32.xlu2 %v968_v52, %s1282_s12  ;;  %v1040_v29 = vpack.c.b16 %v1037_v21, %v1037_v21  ;;  %v1736_v5 = vunpack.c.l.bf16 %v1670_v6  ;;  %v1066_v52 = vpack.c.b16 %v1063_v12, %v1063_v12  ;;  %v1065_v41 = vpack.c.b16 %v1062_v27, %v1062_v27 }
 0x38d   :  { %v706_v23 = vmul.f32 %v1685_v51, %v1378_v40  ;;  %v932_v40 = vmul.f32 %v1338_v15, %v1660_v61  ;;  %v682_v42 = vmul.f32 %v1340_v18, %v1685_v51  ;;  %v949_v15 = vpack.c.bf16 %v947_v37, %v946_v43 }
 0x38e   :  { %v953_v18 = vmul.f32 %v1389_v45, %v1697_v16  ;;  %v701_v30 = vmul.f32 %v1685_v51, %v1415_v55  ;;  %v707_v55 = vmul.f32 %v1367_v34, %v1736_v5  ;;  %v936_v26 = vmul.f32 %v1472_v58, %v1660_v61 }
 0x38f   :  { %v708_v32 = vpack.c.bf16 %v706_v23, %v705_v8  ;;  %v1722_v47 = vpack.c.bf16 %v933_v56, %v932_v40  ;;  %v1724_v44 = vpack.c.bf16 %v682_v42, %v681_v33  ;;  %v1021_v28 = vunpack.c.l.b16 %v949_v15 }
 0x390   :  { %v955_v53 = vpack.c.bf16 %v953_v18, %v953_v18  ;;  %v703_v63 = vpack.c.bf16 %v701_v30, %v700_v48  ;;  %v1041_v14 = vpack.c.b16 %v1038_v39, %v1038_v39  ;;  %v948_v21 = vmul.f32 %v1441_v10, %v1697_v16 }
 0x391   :  { %v810_v36 = vunpack.c.l.b16 %v708_v32  ;;  %v1024_v54 = vpack.c.b16 %v1021_v28, %v1021_v28  ;;  %v811_v34 = vunpack.c.h.b16 %v708_v32  ;;  %v942_v8 = vmul.f32 %v1658_v60, %v1495_v22 }
 0x392   :  { %v1039_v49 = vunpack.c.l.b16 %v955_v53  ;;  %v786_v46 = vunpack.c.l.b16 %v703_v63  ;;  %v950_v33 = vpack.c.bf16 %v948_v21, %v948_v21  ;;  %v1022_v56 = vunpack.c.h.b16 %v949_v15 }
 0x393   :  { %1055 = vrot.lane.b32.xlu1 %v970_v50, %s1281_s11  ;;  %1053 = vrot.lane.b32.xlu0 %v969_v31, %s1281_s11  ;;  %v813_v62 = vpack.c.b16 %v810_v36, %v810_v36  ;;  %v814_v40 = vpack.c.b16 %v811_v34, %v811_v34  ;;  %v702_v42 = vmul.f32 %v1389_v45, %v1736_v5  ;;  %v787_v45 = vunpack.c.h.b16 %v703_v63 }
 0x394   :  { %1067 = vrot.lane.b32.xlu2 %v1064_v19, %s1283_s13  ;;  %v1042_v7 = vpack.c.b16 %v1039_v49, %v1039_v49  ;;  %v939_v19 = vpack.c.bf16 %v937_v4, %v936_v26  ;;  %v1023_v32 = vunpack.c.l.b16 %v950_v33  ;;  %v695_v43 = vmul.f32 %v1443_v11, %v1690_v3 }
 0x395   :  { %v704_v12 = vpack.c.bf16 %v702_v42, %v702_v42  ;;  %v938_v28 = vmul.f32 %v1470_v57, %v1697_v16  ;;  %v686_v11 = vmul.f32 %v1685_v51, %v1478_v1  ;;  %v685_v30 = vmul.f32 %v1472_v58, %v1690_v3 }
 0x396   :  { %v981_v23 = vunpack.c.l.b16 %v939_v19  ;;  %v1026_v38 = vpack.c.b16 %v1023_v32, %v1023_v32  ;;  %v982_v49 = vunpack.c.h.b16 %v939_v19  ;;  %v943_v39 = vmul.f32 %v1487_v9, %v1697_v16 }
 0x397   :  { %v788_v15 = vunpack.c.l.b16 %v704_v12  ;;  %v691_v58 = vmul.f32 %v1685_v51, %v1495_v22 }
 0x398   :  { %v984_v36 = vpack.c.b16 %v981_v23, %v981_v23  ;;  %v985_v4 = vpack.c.b16 %v982_v49, %v982_v49  ;;  %v945_v26 = vpack.c.bf16 %v943_v39, %v943_v39  ;;  %v687_v23 = vmul.f32 %v1470_v57, %v1736_v5 }
 0x399   :  { %v791_v48 = vpack.c.b16 %v788_v15, %v788_v15 }
 0x39b   :  { %804 = vrot.lane.b32.xlu1 %v719_v24, %s1281_s11  ;;  %802 = vrot.lane.b32.xlu0 %v718_v25, %s1281_s11 }
 0x39c   :  { %1043 = vrot.lane.b32.xlu2 %v1040_v29, %s1284_s14  ;;  %v941_v29 = vmul.f32 %v1489_v13, %v1660_v61  ;;  %v696_v61 = vmul.f32 %v1685_v51, %v1452_v20 }
 0x39e   :  { %v944_v37 = vpack.c.bf16 %v942_v8, %v941_v29  ;;  %v698_v18 = vpack.c.bf16 %v696_v61, %v695_v43 }
 0x3a0   :  { %v997_v60 = vunpack.c.l.b16 %v944_v37  ;;  %v770_v20 = vunpack.c.l.b16 %v698_v18  ;;  %v998_v16 = vunpack.c.h.b16 %v944_v37  ;;  %v771_v21 = vunpack.c.h.b16 %v698_v18 }
 0x3a2   :  { %v1000_v27 = vpack.c.b16 %v997_v60, %v997_v60  ;;  %v773_v53 = vpack.c.b16 %v770_v20, %v770_v20 }
 0x3a3   :  { %975 = vrot.lane.b32.xlu1 %v970_v50, %s1282_s12  ;;  %973 = vrot.lane.b32.xlu0 %v969_v31, %s1282_s12  ;;  %v709_v50 = vpack.c.bf16 %v707_v55, %v707_v55  ;;  %v789_v31 = vpack.c.b16 %v786_v46, %v786_v46  ;;  %v690_v55 = vmul.f32 %v1489_v13, %v1690_v3 }
 0x3a4   :  { %816 = vrot.lane.b32.xlu2 %v813_v62, %s1283_s13  ;;  %v1025_v62 = vpack.c.b16 %v1022_v56, %v1022_v56  ;;  %v1001_v13 = vpack.c.b16 %v998_v16, %v998_v16 }
 0x3a5   :  { %v812_v2 = vunpack.c.l.b16 %v709_v50  ;;  %v999_v50 = vunpack.c.l.b16 %v945_v26 }
 0x3a7   :  { %v815_v35 = vpack.c.b16 %v812_v2, %v812_v2  ;;  %v1002_v19 = vpack.c.b16 %v999_v50, %v999_v50 }
 0x3ab   :  { %1071 = vrot.lane.b32.xlu1 %v1066_v52, %s1283_s13  ;;  %1069 = vrot.lane.b32.xlu0 %v1065_v41, %s1283_s13  ;;  %v790_v52 = vpack.c.b16 %v787_v45, %v787_v45  ;;  %v940_v41 = vpack.c.bf16 %v938_v28, %v938_v28 }
 0x3ac   :  { %1027 = vrot.lane.b32.xlu2 %v1024_v54, %s1285_s15  ;;  %v688_v54 = vpack.c.bf16 %v686_v11, %v685_v30 }
 0x3ad   :  { %v983_v63 = vunpack.c.l.b16 %v940_v41 }
 0x3ae   :  { %v730_v1 = vunpack.c.l.b16 %v688_v54  ;;  %v731_v33 = vunpack.c.h.b16 %v688_v54 }
 0x3af   :  { %v986_v46 = vpack.c.b16 %v983_v63, %v983_v63 }
 0x3b0   :  { %v734_v32 = vpack.c.b16 %v731_v33, %v731_v33 }
 0x3b3   :  { %1047 = vrot.lane.b32.xlu1 %v1042_v7, %s1284_s14  ;;  %1045 = vrot.lane.b32.xlu0 %v1041_v14, %s1284_s14  ;;  %v733_v7 = vpack.c.b16 %v730_v1, %v730_v1  ;;  %v693_v14 = vpack.c.bf16 %v691_v58, %v690_v55 }
 0x3b4   :  { %792 = vrot.lane.b32.xlu2 %v789_v31, %s1284_s14  ;;  %v697_v31 = vmul.f32 %v1441_v10, %v1736_v5  ;;  %v774_v10 = vpack.c.b16 %v771_v21, %v771_v21 }
 0x3b5   :  { %v746_v51 = vunpack.c.l.b16 %v693_v14  ;;  %v747_v60 = vunpack.c.h.b16 %v693_v14 }
 0x3b6   :  { %v699_v3 = vpack.c.bf16 %v697_v31, %v697_v31 }
 0x3b7   :  { %v749_v2 = vpack.c.b16 %v746_v51, %v746_v51  ;;  %v750_v43 = vpack.c.b16 %v747_v60, %v747_v60 }
 0x3b8   :  { %v772_v34 = vunpack.c.l.b16 %v699_v3 }
 0x3ba   :  { %v775_v29 = vpack.c.b16 %v772_v34, %v772_v34 }
 0x3bb   :  { %820 = vrot.lane.b32.xlu1 %v815_v35, %s1283_s13  ;;  %818 = vrot.lane.b32.xlu0 %v814_v40, %s1283_s13  ;;  %v689_v35 = vpack.c.bf16 %v687_v23, %v687_v23 }
 0x3bc   :  { %987 = vrot.lane.b32.xlu2 %v984_v36, %s1286_s16  ;;  %v692_v36 = vmul.f32 %v1487_v9, %v1736_v5 }
 0x3bd   :  { %v732_v40 = vunpack.c.l.b16 %v689_v35 }
 0x3be   :  { %v694_v57 = vpack.c.bf16 %v692_v36, %v692_v36 }
 0x3bf   :  { %v735_v37 = vpack.c.b16 %v732_v40, %v732_v40 }
 0x3c0   :  { %v748_v42 = vunpack.c.l.b16 %v694_v57 }
 0x3c2   :  { %v751_v61 = vpack.c.b16 %v748_v42, %v748_v42 }
 0x3c3   :  { %1031 = vrot.lane.b32.xlu1 %v1026_v38, %s1285_s15  ;;  %1029 = vrot.lane.b32.xlu0 %v1025_v62, %s1285_s15 }
 0x3c4   :  { %1003 = vrot.lane.b32.xlu2 %v1000_v27, %s1287_s17 }
 0x3c5   :  { %v1012_v22 = vpop.permute.xlu2 %1011 }
 0x3cb   :  { %796 = vrot.lane.b32.xlu1 %v791_v48, %s1284_s14  ;;  %794 = vrot.lane.b32.xlu0 %v790_v52, %s1284_s14 }
 0x3cc   :  { %776 = vrot.lane.b32.xlu2 %v773_v53, %s1285_s15 }
 0x3cd   :  { %v761_v8 = vpop.permute.xlu2 %760 }
 0x3d3   :  { %991 = vrot.lane.b32.xlu1 %v986_v46, %s1286_s16  ;;  %989 = vrot.lane.b32.xlu0 %v985_v4, %s1286_s16 }
 0x3d4   :  { %736 = vrot.lane.b32.xlu2 %v733_v7, %s1286_s16 }
 0x3d5   :  { %v1052_v56 = vpop.permute.xlu2 %1051 }
 0x3db   :  { %1007 = vrot.lane.b32.xlu1 %v1002_v19, %s1287_s17  ;;  %1005 = vrot.lane.b32.xlu0 %v1001_v13, %s1287_s17 }
 0x3dc   :  { %752 = vrot.lane.b32.xlu2 %v749_v2, %s1287_s17 }
 0x3de   :  { %v801_v17 = vpop.permute.xlu2 %800 }
 0x3e3   :  { %780 = vrot.lane.b32.xlu1 %v775_v29, %s1285_s15  ;;  %778 = vrot.lane.b32.xlu0 %v774_v10, %s1285_s15 }
 0x3e4   :  { %720 = vrot.lane.b32.xlu2 %v717_v59, %s1282_s12 }
 0x3e6   :  { %v1812_v27 = vpop.permute.xlu2 %971 }
 0x3eb   :  { %740 = vrot.lane.b32.xlu1 %v735_v37, %s1286_s16  ;;  %738 = vrot.lane.b32.xlu0 %v734_v32, %s1286_s16 }
 0x3ee   :  { %v1068_v20 = vpop.permute.xlu2 %1067 }
 0x3f3   :  { %756 = vrot.lane.b32.xlu1 %v751_v61, %s1287_s17  ;;  %754 = vrot.lane.b32.xlu0 %v750_v43, %s1287_s17  ;;  %v962_v43 = vunpack.c.l.b16 %v1722_v47 }
 0x3f5   :  { %v1016_v59 = vpop.permute.xlu1 %1015  ;;  %v1014_v38 = vpop.permute.xlu0 %1013 }
 0x3f6   :  { %v1017_v9 = vsel %vm232_vm10, %v1012_v22, %v1014_v38  ;;  %v1018_v5 = vsel %vm232_vm10, %v1014_v38, %v1016_v59 }
 0x3fb   :  { %724 = vrot.lane.b32.xlu1 %v719_v24, %s1282_s12  ;;  %722 = vrot.lane.b32.xlu0 %v718_v25, %s1282_s12  ;;  %v1044_v24 = vpop.permute.xlu2 %1043 }
 0x3fd   :  { %v765_v62 = vpop.permute.xlu1 %764  ;;  %v763_v12 = vpop.permute.xlu0 %762 }
 0x3fe   :  { %v1815_v18 = vsel %vm232_vm10, %v761_v8, %v763_v12  ;;  %v1818_v15 = vsel %vm232_vm10, %v763_v12, %v765_v62 }
 0x403   :  { %v817_v25 = vpop.permute.xlu2 %816 }
 0x405   :  { %v1056_v45 = vpop.permute.xlu1 %1055  ;;  %v1054_v28 = vpop.permute.xlu0 %1053 }
 0x406   :  { %v1057_v1 = vsel %vm275_vm13, %v1052_v56, %v1054_v28  ;;  %v1058_v58 = vsel %vm275_vm13, %v1054_v28, %v1056_v45 }
 0x40b   :  { %v1028_v55 = vpop.permute.xlu2 %1027 }
 0x40d   :  { %v805_v11 = vpop.permute.xlu1 %804  ;;  %v803_v6 = vpop.permute.xlu0 %802 }
 0x40e   :  { %v806_v35 = vsel %vm275_vm13, %v801_v17, %v803_v6  ;;  %v807_v40 = vsel %vm275_vm13, %v803_v6, %v805_v11  ;;  %v963_v17 = vunpack.c.h.b16 %v1722_v47 }
 0x410   :  { %v965_v11 = vpack.c.b16 %v963_v17, %v963_v17 }
 0x413   :  { %v793_v19 = vpop.permute.xlu2 %792 }
 0x415   :  { %v1820_v30 = vpop.permute.xlu1 %975  ;;  %v1822_v0 = vpop.permute.xlu0 %973 }
 0x416   :  { %v977_v28 = vsel %vm189_vm2, %v1812_v27, %v1822_v0  ;;  %v978_v47 = vsel %vm189_vm2, %v1822_v0, %v1820_v30 }
 0x41b   :  { %v988_v8 = vpop.permute.xlu2 %987 }
 0x41d   :  { %v1072_v48 = vpop.permute.xlu1 %1071  ;;  %v1070_v52 = vpop.permute.xlu0 %1069 }
 0x41e   :  { %v1073_v41 = vsel %vm292_vm11, %v1068_v20, %v1070_v52  ;;  %v1074_v53 = vsel %vm292_vm11, %v1070_v52, %v1072_v48  ;;  %v964_v20 = vpack.c.b16 %v962_v43, %v962_v43 }
 0x41f   :  { %v1112_v54 = vsel %vm295_vm12, %v1073_v41, 0  ;;  %v1115_v63 = vsel %vm295_vm12, %v1074_v53, 0 }
 0x420   :  { %1120 = vmatpush.bf16.msrb.mxu2 %v1112_v54  ;;  %1133 = vmatpush.bf16.msrb.mxu3 %v1115_v63  ;;  %v1077_v6 = vsel %vm295_vm12, %v964_v20, %v977_v28 }
 0x423   :  { %v1004_v57 = vpop.permute.xlu2 %1003 }
 0x425   :  { %v1048_v49 = vpop.permute.xlu1 %1047  ;;  %v1046_v39 = vpop.permute.xlu0 %1045 }
 0x426   :  { %v1049_v46 = vsel %vm266_vm14, %v1044_v24, %v1046_v39  ;;  %v1050_v4 = vsel %vm266_vm14, %v1046_v39, %v1048_v49  ;;  %v1081_v24 = vsel %vm295_vm12, %v965_v11, %v978_v47 }
 0x427   :  { %v1101_v26 = vsel %vm295_vm12, %v1049_v46, %v1057_v1  ;;  %v1105_v7 = vsel %vm295_vm12, %v1050_v4, %v1058_v58 }
 0x428   :  { %1121 = vmatpush.bf16.msrb.mxu2 %v1101_v26  ;;  %1134 = vmatpush.bf16.msrb.mxu3 %v1105_v7  ;;  %v711_v26 = vunpack.c.l.b16 %v1724_v44  ;;  %v712_v7 = vunpack.c.h.b16 %v1724_v44 }
 0x42b   :  { %v777_v59 = vpop.permute.xlu2 %776 }
 0x42d   :  { %v821_v14 = vpop.permute.xlu1 %820  ;;  %v819_v50 = vpop.permute.xlu0 %818 }
 0x42e   :  { %v822_v16 = vsel %vm292_vm11, %v817_v25, %v819_v50  ;;  %v823_v31 = vsel %vm292_vm11, %v819_v50, %v821_v14  ;;  %v1107_v25 = vld [vmem:[%s1914_s4] sm:$0xf] }
 0x42f   :  { %v861_v22 = vsel %vm295_vm12, %v822_v16, 0  ;;  %v864_v51 = vsel %vm295_vm12, %v823_v31, 0  ;;  %v713_v31 = vpack.c.b16 %v711_v26, %v711_v26 }
 0x430   :  { %869 = vmatpush.bf16.msrb.mxu0 %v861_v22  ;;  %882 = vmatpush.bf16.msrb.mxu1 %v864_v51  ;;  %v714_v22 = vpack.c.b16 %v712_v7, %v712_v7 }
 0x433   :  { %v737_v53 = vpop.permute.xlu2 %736 }
 0x435   :  { %v1032_v13 = vpop.permute.xlu1 %1031  ;;  %v1030_v3 = vpop.permute.xlu0 %1029 }
 0x436   :  { %v1033_v2 = vsel %vm249_vm15, %v1028_v55, %v1030_v3  ;;  %v1034_v34 = vsel %vm249_vm15, %v1030_v3, %v1032_v13 }
 0x437   :  { %v1093_v21 = vsel %vm295_vm12, %v1017_v9, %v1033_v2  ;;  %v1097_v23 = vsel %vm295_vm12, %v1018_v5, %v1034_v34  ;;  %v856_v2 = vld [vmem:[%s1914_s4] sm:$0xf] }
 0x438   :  { %1122 = vmatpush.bf16.msrb.mxu2 %v1093_v21  ;;  %1135 = vmatpush.bf16.msrb.mxu3 %v1097_v23 }
 0x43b   :  { %v753_v49 = vpop.permute.xlu2 %752 }
 0x43d   :  { %v797_v29 = vpop.permute.xlu1 %796  ;;  %v795_v10 = vpop.permute.xlu0 %794 }
 0x43e   :  { %v798_v33 = vsel %vm266_vm14, %v793_v19, %v795_v10  ;;  %v799_v36 = vsel %vm266_vm14, %v795_v10, %v797_v29 }
 0x43f   :  { %v850_v37 = vsel %vm295_vm12, %v798_v33, %v806_v35  ;;  %v854_v32 = vsel %vm295_vm12, %v799_v36, %v807_v40 }
 0x440   :  { %870 = vmatpush.bf16.msrb.mxu0 %v850_v37  ;;  %883 = vmatpush.bf16.msrb.mxu1 %v854_v32 }
 0x443   :  { %v721_v14 = vpop.permute.xlu2 %720 }
 0x445   :  { %v992_v56 = vpop.permute.xlu1 %991  ;;  %v990_v42 = vpop.permute.xlu0 %989 }
 0x446   :  { %v993_v38 = vsel %vm206_vm0, %v988_v8, %v990_v42  ;;  %v994_v9 = vsel %vm206_vm0, %v990_v42, %v992_v56 }
 0x44d   :  { %v1008_v60 = vpop.permute.xlu1 %1007  ;;  %v1006_v61 = vpop.permute.xlu0 %1005 }
 0x44e   :  { %v1009_v5 = vsel %vm223_vm1, %v1004_v57, %v1006_v61  ;;  %v1010_v62 = vsel %vm223_vm1, %v1006_v61, %v1008_v60 }
 0x44f   :  { %v1085_v12 = vsel %vm295_vm12, %v993_v38, %v1009_v5  ;;  %v1089_v45 = vsel %vm295_vm12, %v994_v9, %v1010_v62 }
 0x450   :  { %1123 = vmatpush.bf16.msrb.mxu2 %v1085_v12  ;;  %1136 = vmatpush.bf16.msrb.mxu3 %v1089_v45 }
 0x454   :  { %1124 = vmatpush.bf16.msrb.mxu2 %v1077_v6  ;;  %1137 = vmatpush.bf16.msrb.mxu3 %v1081_v24 }
 0x455   :  { %v781_v48 = vpop.permute.xlu1 %780  ;;  %v779_v27 = vpop.permute.xlu0 %778 }
 0x456   :  { %v782_v52 = vsel %vm249_vm15, %v777_v59, %v779_v27  ;;  %v783_v30 = vsel %vm249_vm15, %v779_v27, %v781_v48 }
 0x457   :  { %v842_v0 = vsel %vm295_vm12, %v1815_v18, %v782_v52  ;;  %v846_v41 = vsel %vm295_vm12, %v1818_v15, %v783_v30  ;;  %1222 = vmatmul.msk.bf16.vlgmr.msrb.gmra.mxu2 %vm329_vm3, %v1107_v25  ;;  %1223 = vmatmul.msk.bf16.vlgmr.msrb.gmra.mxu3 %vm329_vm3, %v1107_v25  ;;  %v1155_v25 = vld [vmem:[%s1915_s5] sm:$0xff] }
 0x458   :  { %871 = vmatpush.bf16.msrb.mxu0 %v842_v0  ;;  %884 = vmatpush.bf16.msrb.mxu1 %v846_v41  ;;  %v1156_v30 = vld [vmem:[%s1916_s6] sm:$0xff] }
 0x45d   :  { %v741_v54 = vpop.permute.xlu1 %740  ;;  %v739_v63 = vpop.permute.xlu0 %738 }
 0x45e   :  { %v742_v58 = vsel %vm206_vm0, %v737_v53, %v739_v63  ;;  %v743_v55 = vsel %vm206_vm0, %v739_v63, %v741_v54 }
 0x465   :  { %v757_v39 = vpop.permute.xlu1 %756  ;;  %v755_v1 = vpop.permute.xlu0 %754 }
 0x466   :  { %v758_v18 = vsel %vm223_vm1, %v753_v49, %v755_v1  ;;  %v759_v15 = vsel %vm223_vm1, %v755_v1, %v757_v39 }
 0x467   :  { %v834_v46 = vsel %vm295_vm12, %v742_v58, %v758_v18  ;;  %v838_v4 = vsel %vm295_vm12, %v743_v55, %v759_v15 }
 0x468   :  { %872 = vmatpush.bf16.msrb.mxu0 %v834_v46  ;;  %885 = vmatpush.bf16.msrb.mxu1 %v838_v4 }
 0x46d   :  { %v725_v50 = vpop.permute.xlu1 %724  ;;  %v723_v16 = vpop.permute.xlu0 %722 }
 0x46e   :  { %v726_v51 = vsel %vm189_vm2, %v721_v14, %v723_v16  ;;  %v727_v19 = vsel %vm189_vm2, %v723_v16, %v725_v50 }
 0x46f   :  { %v826_v13 = vsel %vm295_vm12, %v713_v31, %v726_v51  ;;  %v830_v3 = vsel %vm295_vm12, %v714_v22, %v727_v19 }
 0x470   :  { %873 = vmatpush.bf16.msrb.mxu0 %v826_v13  ;;  %886 = vmatpush.bf16.msrb.mxu1 %v830_v3 }
 0x473   :  { %1220 = vmatmul.msk.bf16.vlgmr.msrb.gmra.mxu0 %vm329_vm3, %v856_v2  ;;  %1221 = vmatmul.msk.bf16.vlgmr.msrb.gmra.mxu1 %vm329_vm3, %v856_v2 }
 0x4da   :  { %v1126_v44 = vpop.f32.mrf.mxu2  ;;  %v1139_v34 = vpop.f32.mrf.mxu3 }
 0x4db   :  { %v1145_v21 = vadd.f32 %v1139_v34, %v1126_v44  ;;  %v1149_v37 = vmul.f32 %v1126_v44, %v1126_v44  ;;  %v1150_v32 = vmul.f32 %v1139_v34, %v1139_v34 }
 0x4dd   :  { %1146 = vadd.xlane.f32.xlu0 %v1145_v21  ;;  %v1151_v57 = vadd.f32 %v1150_v32, %v1149_v37 }
 0x4e2   :  { %v1128_v23 = vpop.f32.mrf.mxu2  ;;  %v1141_v8 = vpop.f32.mrf.mxu3 }
 0x4f0   :  { %v875_v29 = vpop.f32.mrf.mxu0  ;;  %v888_v10 = vpop.f32.mrf.mxu1 }
 0x4f1   :  { %v894_v35 = vadd.f32 %v888_v10, %v875_v29  ;;  %v898_v40 = vmul.f32 %v875_v29, %v875_v29  ;;  %v899_v33 = vmul.f32 %v888_v10, %v888_v10 }
 0x4f3   :  { %895 = vadd.xlane.f32.xlu2 %v894_v35  ;;  %v900_v36 = vadd.f32 %v899_v33, %v898_v40 }
 0x4f5   :  { %901 = vadd.xlane.f32.xlu1 %v900_v36 }
 0x4f8   :  { %v877_v56 = vpop.f32.mrf.mxu0  ;;  %v890_v42 = vpop.f32.mrf.mxu1 }
 0x4fb   :  { %1152 = vadd.xlane.f32.xlu2 %v1151_v57 }
 0x550   :  { %v1147_v60 = vpop.xlane.xlu0 %1146 }
 0x566   :  { %v896_v61 = vpop.xlane.xlu2 %895 }
 0x567   :  { %v1148_v43 = vadd.f32 %v1147_v60, %v896_v61 }
 0x568   :  { %v902_v59 = vpop.xlane.xlu1 %901 }
 0x569   :  { %v1157_v17 = vmul.f32 0.001953125, %v1148_v43 }
 0x56b   :  { %v1159_v5 = vmul.f32 %v1157_v17, %v1157_v17 }
 0x56e   :  { %v1153_v38 = vpop.xlane.xlu2 %1152 }
 0x56f   :  { %v1154_v9 = vadd.f32 %v1153_v38, %v902_v59 }
 0x571   :  { %v1158_v62 = vmul.f32 0.001953125, %v1154_v9 }
 0x573   :  { %v1160_v12 = vsub.f32 %v1158_v62, %v1159_v5 }
 0x575   :  { %v1161_v45 = vmax.f32 %v1160_v12, 0.0 }
 0x577   :  { %v1162_v28 = vadd.f32 1e-05, %v1161_v45 }
 0x579   :  { %1271 = vrsqrt.f32 %v1162_v28  ;;  %vm1169_vm8 = vweird.f32 %v1162_v28 }
 0x57f   :  { %v1272_v47 = vpop.eup %1271 }
 0x580   :  { %v1164_v20 = vmul.f32 %v1272_v47, %v1162_v28  ;;  %vm1170_vm4 = vweird.f32 %v1272_v47 }
 0x581   :  { %vm1171_vm9 = vmor %vm1169_vm8, %vm1170_vm4 }
 0x582   :  { %v1165_v11 = vmul.f32 %v1272_v47, %v1164_v20 }
 0x584   :  { %v1166_v6 = vmul.f32 0.5, %v1165_v11 }
 0x586   :  { %v1167_v24 = vsub.f32 1.5, %v1166_v6 }
 0x588   :  { %v1168_v48 = vmul.f32 %v1272_v47, %v1167_v24 }
 0x58a   :  { %v1172_v27 = vsel %vm1171_vm9, %v1272_v47, %v1168_v48 }
 0x58b   :  { %v1173_v52 = vmul.f32 %v1172_v27, %v1155_v25 }
 0x58d   :  { %1180 = vperm.xlu0 %1267, %v1173_v52   ;;  %v1174_v0 = vmul.f32 %v1173_v52, %v1157_v17 }
 0x58f   :  { %v1175_v41 = vsub.f32 %v1156_v30, %v1174_v0 }
 0x591   :  { %1187 = vperm.xlu1 %1268, %v1175_v41  }
 0x5ff   :  { %v1181_v53 = vpop.permute.xlu0 %1180 }
 0x600   :  { %v1183_v54 = vmul.f32 %v1181_v53, %v875_v29  ;;  %v1184_v63 = vmul.f32 %v1181_v53, %v888_v10  ;;  %v1198_v49 = vmul.f32 %v1181_v53, %v1126_v44  ;;  %v1199_v39 = vmul.f32 %v1181_v53, %v1139_v34 }
 0x603   :  { %v1188_v1 = vpop.permute.xlu1 %1187 }
 0x604   :  { %v1190_v58 = vadd.f32 %v1188_v1, %v1183_v54  ;;  %v1191_v55 = vadd.f32 %v1188_v1, %v1184_v63  ;;  %v1200_v18 = vadd.f32 %v1198_v49, %v1188_v1  ;;  %v1201_v15 = vadd.f32 %v1199_v39, %v1188_v1 }
 0x606   :  { %v1192_v46 = vmax.f32 %v1190_v58, 0.0  ;;  %v1193_v4 = vmax.f32 %v1191_v55, 0.0  ;;  %v1202_v26 = vmax.f32 %v1200_v18, 0.0  ;;  %v1203_v7 = vmax.f32 %v1201_v15, 0.0 }
 0x608   :  { %1194 = vst [vmem:[%s1917_s7] sm:$0xff] %v1192_v46 }
 0x609   :  { %1195 = vst [vmem:[%s1917_s7 + $0x8] sm:$0xff] %v1193_v4 }
 0x60a   :  { %1224 = vst [vmem:[%s1917_s7 + $0x10] sm:$0xff] %v1202_v26 }
 0x60b   :  { %1225 = vst [vmem:[%s1917_s7 + $0x18] sm:$0xff] %v1203_v7 }

</bundles_post_ra>
